<compile_context>
chip_gen: v7x
topology: tpu7x:2x2x1
jax: 0.10.0
libtpu: 0.0.40
codegen_flags: <defaults>
</compile_context>

<pallas_src>
import functools

import jax
import jax.numpy as jnp
from jax.experimental import pallas as pl
from jax.experimental.pallas import tpu as pltpu


# ----------------------------- helpers --------------------------------------- #

def _round_up(v, m):
    return ((v + m - 1) // m) * m


def _vmem_cap_bytes():
    """Generation-aware VMEM cap (85% of physical), with a safe fallback."""
    try:
        return max(16 << 20, int(0.85 * pltpu.get_tpu_info().vmem_capacity_bytes))
    except Exception:
        return 56 << 20   # safe on v7x (64 MiB) and conservative on v5e/v6e (128 MiB)


# ----------------------------- Pallas kernel --------------------------------- #

def _aggregate_kernel(a_ref, xw_ref, b_ref, o_ref, *, apply_relu):
    """One GCN aggregation row block: o = [relu](A_block @ XW + b).

    a_ref : [tm, Np]    bf16  normalized-adjacency row block (streamed)
    xw_ref: [Np, Hp]    bf16  pre-transformed features (resident, single-buffered)
    b_ref : [1, Hp]     f32   bias
    o_ref : [tm, Hp]    f32 or bf16
    """
    acc = jnp.dot(a_ref[...], xw_ref[...], preferred_element_type=jnp.float32)
    acc = acc + b_ref[...]
    if apply_relu:
        acc = jnp.maximum(acc, 0.0)
    o_ref[...] = acc.astype(o_ref.dtype)


def gcn_aggregate(a_p, xw_p, b_p, *, apply_relu, out_dtype, tm):
    """out[n_pad, h_pad] = [relu](A_hat @ XW + b), tiled over row blocks of size tm."""
    n_pad = a_p.shape[0]
    h_pad = xw_p.shape[1]
    assert n_pad % tm == 0 and tm % 128 == 0 and h_pad % 128 == 0
    num_blocks = n_pad // tm
    out_itemsize = jnp.dtype(out_dtype).itemsize

    def vmem_need(const_buffers):
        return (2 * tm * n_pad * 2                       # A row blocks, double buffered
                + const_buffers * n_pad * h_pad * 2      # XW (resident)
                + const_buffers * 8 * h_pad * 4          # bias (sublane-padded)
                + 2 * tm * h_pad * out_itemsize)         # output blocks

    cap = _vmem_cap_bytes()
    kernel = functools.partial(_aggregate_kernel, apply_relu=apply_relu)

    last_err = None
    for single_buffer in (True, False):
        const_buffers = 1 if single_buffer else 2
        vmem_limit = min(cap, max(16 << 20,
                                  int(1.5 * vmem_need(const_buffers)) + (1 << 20)))
        try:
            if single_buffer:
                const_kw = dict(pipeline_mode=pl.Buffered(1))
            else:
                const_kw = {}
            return pl.pallas_call(
                kernel,
                out_shape=jax.ShapeDtypeStruct((n_pad, h_pad), out_dtype),
                grid=(num_blocks,),
                in_specs=[
                    pl.BlockSpec((tm, n_pad), lambda i: (i, 0)),              # A block
                    pl.BlockSpec((n_pad, h_pad), lambda i: (0, 0), **const_kw),  # XW
                    pl.BlockSpec((1, h_pad), lambda i: (0, 0), **const_kw),      # bias
                ],
                out_specs=pl.BlockSpec((tm, h_pad), lambda i: (i, 0)),
                compiler_params=pltpu.CompilerParams(
                    # Row blocks are fully independent -> shard across TCs on v7x.
                    dimension_semantics=("parallel",),
                    vmem_limit_bytes=vmem_limit,
                ),
            )(a_p, xw_p, b_p)
        except Exception as e:   # e.g. pipeline_mode unsupported -> double-buffer fallback
            last_err = e
    raise last_err


# ------------------------------ forward wrapper ------------------------------- #

def gcn_fused_forward(a_hat, x, w1, b1, w2, b2, *, tm=256):
    """2-layer GCN forward. Returns float32 logits [num_nodes, num_classes]."""
    n = a_hat.shape[0]
    f, h = w1.shape
    c = w2.shape[1]
    bf16 = jnp.bfloat16

    # Row-block size: multiple of 128; a single full block for small graphs.
    n128 = _round_up(n, 128)
    tm = max(128, (int(tm) // 128) * 128)
    if n128 <= tm:
        tm = n128
    n_pad = _round_up(n, tm)
    h_pad = _round_up(h, 128)
    c_pad = _round_up(c, 128)

    # Lane-dense, zero-padded, bf16 MXU operands (f32 accumulation everywhere).
    a_p = jnp.zeros((n_pad, n_pad), bf16).at[:n, :n].set(a_hat.astype(bf16))
    x_p = jnp.zeros((n_pad, f), bf16).at[:n, :].set(x.astype(bf16))
    w1_p = jnp.zeros((f, h_pad), bf16).at[:, :h].set(w1.astype(bf16))
    w2_p = jnp.zeros((h_pad, c_pad), bf16).at[:h, :c].set(w2.astype(bf16))
    b1_p = jnp.zeros((1, h_pad), jnp.float32).at[0, :h].set(b1)
    b2_p = jnp.zeros((1, c_pad), jnp.float32).at[0, :c].set(b2)

    # ---- layer 1: feature transform hoisted to XLA, aggregation in Pallas -------
    xw1 = jnp.dot(x_p, w1_p, preferred_element_type=jnp.float32).astype(bf16)
    h1 = gcn_aggregate(a_p, xw1, b1_p, apply_relu=True, out_dtype=bf16, tm=tm)

    # Dropout(p=0.5, training=False) == identity in eval mode.

    # ---- layer 2 -----------------------------------------------------------------
    hw2 = jnp.dot(h1, w2_p, preferred_element_type=jnp.float32).astype(bf16)
    out_p = gcn_aggregate(a_p, hw2, b2_p, apply_relu=False,
                          out_dtype=jnp.float32, tm=tm)
    return out_p[:n, :c]


# ------------------------------ JAX glue -------------------------------------- #

def normalized_adjacency(edge_index, num_nodes):
    """Dense PyG gcn_norm: A_hat = D^-1/2 (A + I) D^-1/2 with A[dst, src] = 1.

    Message flow matches GCNConv (source -> target). Self loops are SET on the
    diagonal (duplicate edges are deduped by the dense .set; only differs from PyG
    for multigraph edge_index inputs).
    """
    src, dst = edge_index[0], edge_index[1]
    a = jnp.zeros((num_nodes, num_nodes), jnp.float32)
    a = a.at[dst, src].set(1.0)
    idx = jnp.arange(num_nodes)
    a = a.at[idx, idx].set(1.0)
    deg = a.sum(axis=1)
    d_inv_sqrt = jnp.where(deg > 0, jax.lax.rsqrt(deg), 0.0)
    return d_inv_sqrt[:, None] * a * d_inv_sqrt[None, :]


def glorot(key, shape):
    limit = jnp.sqrt(6.0 / (shape[0] + shape[1]))
    return jax.random.uniform(key, shape, jnp.float32, -limit, limit)


def gcn_forward(params, x, edge_index, num_nodes):
    a_hat = normalized_adjacency(edge_index, num_nodes)
    return gcn_fused_forward(a_hat, x, params["w1"], params["b1"],
                             params["w2"], params["b2"])


# -------------------------------- main ----------------------------------------- #

if __name__ == "__main__":
    # Small synthetic Cora-like problem (7 classes, hidden_channels=16).
    NUM_NODES = 512          # 2 row blocks of tm=256
    NUM_FEATURES = 100
    HIDDEN_CHANNELS = 16     # padded to 128 inside the wrapper
    NUM_CLASSES = 7          # padded to 128 inside the wrapper
    NUM_EDGES = 2048

    key = jax.random.PRNGKey(0)
    k_x, k_src, k_dst, k_w1, k_w2 = jax.random.split(key, 5)

    # Node features (row-normalized like NormalizeFeatures()).
    x = jax.random.uniform(k_x, (NUM_NODES, NUM_FEATURES), jnp.float32)
    x = x / jnp.clip(x.sum(axis=-1, keepdims=True), 1e-12)

    # Random edge_index [2, E].
    src = jax.random.randint(k_src, (NUM_EDGES,), 0, NUM_NODES)
    dst = jax.random.randint(k_dst, (NUM_EDGES,), 0, NUM_NODES)
    edge_index = jnp.stack([src, dst], axis=0).astype(jnp.int32)

    # Deterministic parameter init (GCNConv: glorot weight, zero bias).
    params = {
        "w1": glorot(k_w1, (NUM_FEATURES, HIDDEN_CHANNELS)),
        "b1": jnp.zeros((HIDDEN_CHANNELS,), jnp.float32),
        "w2": glorot(k_w2, (HIDDEN_CHANNELS, NUM_CLASSES)),
        "b2": jnp.zeros((NUM_CLASSES,), jnp.float32),
    }

    out = gcn_forward(params, x, edge_index, NUM_NODES)
    out = jax.block_until_ready(out)
    assert out.shape == (NUM_NODES, NUM_CLASSES), out.shape
    assert out.dtype == jnp.float32
    assert bool(jnp.all(jnp.isfinite(out)))
    print("KERNEL_OK")
</pallas_src>

<mosaic_0001>
module attributes {stable_mosaic.version = 11 : i64} {
  func.func @_aggregate_kernel(%arg0: i32, %arg1: memref<256x512xbf16, #tpu.memory_space<vmem>>, %arg2: memref<512x128xbf16, #tpu.memory_space<vmem>>, %arg3: memref<1x128xf32, #tpu.memory_space<vmem>>, %arg4: memref<256x128xbf16, #tpu.memory_space<vmem>>) attributes {dimension_semantics = [#tpu.dimension_semantics<parallel>], iteration_bounds = array<i64: 2>, scalar_prefetch = 0 : i64, scratch_operands = 0 : i64, tpu.core_type = #tpu.core_type<tc>, window_params = [{transform_indices = @transform_0, window_bounds = array<i64: 256, 512>}, {pipeline_mode = #tpu.pipeline_mode<synchronous>, transform_indices = @transform_1, window_bounds = array<i64: 512, 128>}, {pipeline_mode = #tpu.pipeline_mode<synchronous>, transform_indices = @transform_2, window_bounds = array<i64: 1, 128>}, {transform_indices = @transform_3, window_bounds = array<i64: 256, 128>}]} {
    %c0 = arith.constant 0 : index
    %c0_0 = arith.constant 0 : index
    %0 = vector.load %arg1[%c0, %c0_0] : memref<256x512xbf16, #tpu.memory_space<vmem>>, vector<256x512xbf16>
    %c0_1 = arith.constant 0 : index
    %c0_2 = arith.constant 0 : index
    %1 = vector.load %arg2[%c0_1, %c0_2] : memref<512x128xbf16, #tpu.memory_space<vmem>>, vector<512x128xbf16>
    %cst = arith.constant dense<0.000000e+00> : vector<256x128xf32>
    %2 = tpu.matmul %0, %1, %cst {dimension_numbers = #tpu.dot_dimension_numbers<[1], [0], [0], [1], [0, 0, 1, 1], [], []>} : vector<256x512xbf16>, vector<512x128xbf16>, vector<256x128xf32> -> vector<256x128xf32>
    %c0_3 = arith.constant 0 : index
    %c0_4 = arith.constant 0 : index
    %3 = vector.load %arg3[%c0_3, %c0_4] : memref<1x128xf32, #tpu.memory_space<vmem>>, vector<1x128xf32>
    %4 = vector.broadcast %3 : vector<1x128xf32> to vector<256x128xf32>
    %5 = arith.addf %2, %4 : vector<256x128xf32>
    %cst_5 = arith.constant 0.000000e+00 : f32
    %6 = vector.broadcast %cst_5 : f32 to vector<256x128xf32>
    %7 = arith.maximumf %5, %6 : vector<256x128xf32>
    %8 = arith.truncf %7 : vector<256x128xf32> to vector<256x128xbf16>
    %c0_6 = arith.constant 0 : index
    %c0_7 = arith.constant 0 : index
    %9 = vector.load %arg4[%c0_6, %c0_7] : memref<256x128xbf16, #tpu.memory_space<vmem>>, vector<256x128xbf16>
    tpu.vector_store %arg4[%c0_6, %c0_7], %8 {strides = array<i32>} : memref<256x128xbf16, #tpu.memory_space<vmem>>, vector<256x128xbf16>,
    return
  }
  func.func @transform_0(%arg0: i32) -> (i32, i32) {
    %c0_i32 = arith.constant 0 : i32
    %c0_i32_0 = arith.constant 0 : i32
    return %arg0, %c0_i32 : i32, i32
  }
  func.func @transform_1(%arg0: i32) -> (i32, i32) {
    %c0_i32 = arith.constant 0 : i32
    %c0_i32_0 = arith.constant 0 : i32
    %c0_i32_1 = arith.constant 0 : i32
    return %c0_i32, %c0_i32_0 : i32, i32
  }
  func.func @transform_2(%arg0: i32) -> (i32, i32) {
    %c0_i32 = arith.constant 0 : i32
    %c0_i32_0 = arith.constant 0 : i32
    %c0_i32_1 = arith.constant 0 : i32
    return %c0_i32, %c0_i32_0 : i32, i32
  }
  func.func @transform_3(%arg0: i32) -> (i32, i32) {
    %c0_i32 = arith.constant 0 : i32
    %c0_i32_0 = arith.constant 0 : i32
    return %arg0, %c0_i32 : i32, i32
  }
}

module attributes {stable_mosaic.version = 11 : i64} {
  func.func @_aggregate_kernel(%arg0: i32, %arg1: memref<256x512xbf16, #tpu.memory_space<vmem>>, %arg2: memref<512x128xbf16, #tpu.memory_space<vmem>>, %arg3: memref<1x128xf32, #tpu.memory_space<vmem>>, %arg4: memref<256x128xbf16, #tpu.memory_space<vmem>>) attributes {dimension_semantics = [#tpu.dimension_semantics<parallel>], iteration_bounds = array<i64: 2>, scalar_prefetch = 0 : i64, scratch_operands = 0 : i64, tpu.core_type = #tpu.core_type<tc>, window_params = [{transform_indices = @transform_0, window_bounds = array<i64: 256, 512>}, {pipeline_mode = #tpu.pipeline_mode<synchronous>, transform_indices = @transform_1, window_bounds = array<i64: 512, 128>}, {pipeline_mode = #tpu.pipeline_mode<synchronous>, transform_indices = @transform_2, window_bounds = array<i64: 1, 128>}, {transform_indices = @transform_3, window_bounds = array<i64: 256, 128>}]} {
    %c0 = arith.constant 0 : index
    %c0_0 = arith.constant 0 : index
    %0 = vector.load %arg1[%c0, %c0_0] : memref<256x512xbf16, #tpu.memory_space<vmem>>, vector<256x512xbf16>
    %c0_1 = arith.constant 0 : index
    %c0_2 = arith.constant 0 : index
    %1 = vector.load %arg2[%c0_1, %c0_2] : memref<512x128xbf16, #tpu.memory_space<vmem>>, vector<512x128xbf16>
    %cst = arith.constant dense<0.000000e+00> : vector<256x128xf32>
    %2 = tpu.matmul %0, %1, %cst {dimension_numbers = #tpu.dot_dimension_numbers<[1], [0], [0], [1], [0, 0, 1, 1], [], []>} : vector<256x512xbf16>, vector<512x128xbf16>, vector<256x128xf32> -> vector<256x128xf32>
    %c0_3 = arith.constant 0 : index
    %c0_4 = arith.constant 0 : index
    %3 = vector.load %arg3[%c0_3, %c0_4] : memref<1x128xf32, #tpu.memory_space<vmem>>, vector<1x128xf32>
    %4 = vector.broadcast %3 : vector<1x128xf32> to vector<256x128xf32>
    %5 = arith.addf %2, %4 : vector<256x128xf32>
    %cst_5 = arith.constant 0.000000e+00 : f32
    %6 = vector.broadcast %cst_5 : f32 to vector<256x128xf32>
    %7 = arith.maximumf %5, %6 : vector<256x128xf32>
    %8 = arith.truncf %7 : vector<256x128xf32> to vector<256x128xbf16>
    %c0_6 = arith.constant 0 : index
    %c0_7 = arith.constant 0 : index
    %9 = vector.load %arg4[%c0_6, %c0_7] : memref<256x128xbf16, #tpu.memory_space<vmem>>, vector<256x128xbf16>
    tpu.vector_store %arg4[%c0_6, %c0_7], %8 {strides = array<i32>} : memref<256x128xbf16, #tpu.memory_space<vmem>>, vector<256x128xbf16>,
    return
  }
  func.func @transform_0(%arg0: i32) -> (i32, i32) {
    %c0_i32 = arith.constant 0 : i32
    %c0_i32_0 = arith.constant 0 : i32
    return %arg0, %c0_i32 : i32, i32
  }
  func.func @transform_1(%arg0: i32) -> (i32, i32) {
    %c0_i32 = arith.constant 0 : i32
    %c0_i32_0 = arith.constant 0 : i32
    %c0_i32_1 = arith.constant 0 : i32
    return %c0_i32, %c0_i32_0 : i32, i32
  }
  func.func @transform_2(%arg0: i32) -> (i32, i32) {
    %c0_i32 = arith.constant 0 : i32
    %c0_i32_0 = arith.constant 0 : i32
    %c0_i32_1 = arith.constant 0 : i32
    return %c0_i32, %c0_i32_0 : i32, i32
  }
  func.func @transform_3(%arg0: i32) -> (i32, i32) {
    %c0_i32 = arith.constant 0 : i32
    %c0_i32_0 = arith.constant 0 : i32
    return %arg0, %c0_i32 : i32, i32
  }
}

</mosaic_0001>

<bundles_post_ra>
// kernel: tpu_custom_call.1
= control target key start
LH: loop header
LB: loop body
LE: loop exit
PB: predicated region body
PF: predicated region fallthrough
CT: control target
= control target key end

     0   :  { %8 = vsyncpa [#allocation3], 0  ;;  %s2640_s0 = inlined_call_operand.hbm [shape: bf16[512,512], index: 0, kind: input, shape index: {}]   ;;  %s2641_s1 = inlined_call_operand.hbm [shape: bf16[512,128], index: 1, kind: input, shape index: {}]   ;;  %s2642_s2 = inlined_call_operand.vmem [shape: f32[1,128], index: 2, kind: input, shape index: {}]   ;;  %s2643_s3 = inlined_call_operand.hbm [shape: bf16[512,128], index: 3, kind: output, shape index: {}]  }
   0x1   :  { %10 = vsyncpa [#allocation3 + $0x1], 0 }
   0x2   :  { %11 = vsyncpa [#allocation6], 0 }
   0x3   :  { %12 = vsyncpa [#allocation4], 0 }
   0x4   :  { %14 = vsyncpa [#allocation4 + $0x1], 0  ;;  %s2316_s12 = smov 0   ;;  %s2318_s13 = smov 0  }
   0x5   :  { %s2320_s14 = smov 0   ;;  %s2322_s15 = smov 0  }
   0x6 LB: > { %s2337_s16 = sadd.s32 4294967295, %s2285_s15   ;;  %s1466_s17 = sadd.s32 4294967294, %s2285_s15   ;;  %s2285_s15 = sphi %s2322_s15, %s2663_s15   ;;  %s2281_s14 = sphi %s2320_s14, %s2662_s14   ;;  %s2277_s13 = sphi %s2318_s13, %s2661_s13   ;;  %s2273_s12 = sphi %s2316_s12, %s2660_s12  }
   0x7   : > { %p40_p0 = scmp.ne.s32.totalorder %s2277_s13, %s2273_s12  ;;  %p2644_p1 = scmp.eq.s32.totalorder %s2337_s16, 0 }
   0x8   : > { %p112_p3 = scmp.eq.s32.totalorder %s1466_s17, 1  ;;  %p1467_p5 = scmp.ge.s32.totalorder %s2285_s15, 1 }
   0x9   : > { %p2346_p4 = por %p2644_p1, %p40_p0  ;;  %p119_p7 = scmp.lt.s32.totalorder %s2285_s15, 3 }
   0xa   : > { %p2351_p6 = por %p112_p3, %p40_p0  ;;  %s2287_s21 = smov [#allocation5]  }
   0xb   : > { %s2647_s18 = scalar_select %p2346_p4, 1, 0 }
   0xc   : > { %s2648_s19 = scalar_select %p2351_p6, 1, 0 }
   0xd   : > { %p2356_p8 = pnand %p1467_p5, %p119_p7  ;;  %s131_s22 = sshll.u32 %s2287_s21, 4  ;;  %s2360_s22 = int_to_ptr.vmem [resolvable:$true] %s131_s22 }
   0xe   : > { %s2372_s24 = sadd.s32 1, %s2285_s15   ;;  %s27_s25 = sadd.s32 1, %s2281_s14 }
   0xf   : > { %s2649_s20 = scalar_select %p2356_p8, 1, 0 }
  0x10   : > { %p1974_p9 = pneg %p2356_p8  ;;  %s24_s26 = ssub.s32 %s2285_s15, %s2372_s24 }
  0x11   : > { %s2157_s29 = scalar_lea.hbm %s2641_s1, 4096 }
  0x12   : > { %p2367_p11 = pnand %p1974_p9, %p2644_p1  ;;  %p2158_p12 = scmp.ne.s32.totalorder %s2641_s1, %s2157_s29 }
  0x13   : > { %p2164_p5 = scmp.lt.u32.totalorder %s2157_s29, %s2641_s1 }
  0x14   : > { %p2159_p13 = pneg %p2367_p11 }
  0x16   : > { %p2160_p0 = pnand %p2159_p13, %p2158_p12 }
  0x18   : > { %p2161_p3 = pneg %p2160_p0 }
  0x1a   : > { %p2166_p7 = pnand %p2164_p5, %p2161_p3 }
  0x1c   : > { %2169 = shalt.err (!%p2166_p7)
}
  0x1d   : > { %s2170_s7 = scalar_lea.vmem %s2360_s22, 4096  ;;  %p2178_p2 = scmp.lt.s32.totalorder %s2360_s22, %s2360_s22 }
  0x1e   : > { %p2171_p9 = scmp.ne.s32.totalorder %s2360_s22, %s2170_s7  ;;  %p2179_p6 = scmp.lt.s32.totalorder %s2170_s7, %s2170_s7 }
  0x20   : > { %p2173_p10 = pnand %p2171_p9, %p2159_p13  ;;  %p2180_p4 = por %p2179_p6, %p2178_p2 }
  0x22   : > { %p2174_p1 = pneg %p2173_p10 }
  0x24   : > { %p2181_p8 = pnand %p2180_p4, %p2174_p1 }
  0x26   : > { %2184 = shalt.err (!%p2181_p8)
}
  0x27   : > { %s2288_s8 = smov 64   ;;  %s2289_s9 = smov 4  }
  0x28   : > { %1977 = dma.hbm_to_vmem [thread:$0]  (!%p2367_p11), %s2641_s1, 4096, %s2360_s22, [#allocation6], %s2288_s8, %s2288_s8, %s2289_s9  }
  0x29   : > { %p25_p2 = scmp.eq.s32.totalorder %s24_s26, 0  ;;  %p34_p1 = scmp.ne.s32.totalorder %s2281_s14, %s2277_s13 }
  0x2a   : > { %p35_p4 = scmp.eq.s32.totalorder %s2285_s15, 0  ;;  %p1987_p6 = scmp.lt.s32.totalorder %s2285_s15, 2 }
  0x2b   : > { %s2403_s17 = scalar_select %p25_p2, %s2281_s14, %s27_s25  }
  0x2c   : > { %p36_p8 = por %p35_p4, %p34_p1  ;;  %p2651_p10 = scmp.eq.s32.totalorder %s2337_s16, 1 }
  0x2d   : > { %s148_s27 = sand.u32 1, %s2281_s14   ;;  %s1613_s28 = sshll.u32 %s2285_s15, 13 }
  0x2e   : > { %p2407_p12 = por %p2651_p10, %p34_p1  ;;  %s1470_s29 = sshll.u32 %s148_s27, 9 }
  0x2f   : > { %s2416_s4 = scalar_lea.hbm %s2640_s0, %s1613_s28  ;;  %s152_s22 = scalar_lea.vmem [#allocation2], %s1470_s29 }
  0x30   : > { %s160_s25 = sshll.u32 %s152_s22, 4  ;;  %p2418_p11 = pnand %p1987_p6, %p36_p8  ;;  %s2422_s25 = int_to_ptr.vmem [resolvable:$true] %s160_s25 }
  0x31   : > { %s2424_s5 = scalar_lea.sflag [#allocation3], %s148_s27  ;;  %s2185_s6 = scalar_lea.hbm %s2416_s4, 8192 }
  0x32   : > { %p2186_p13 = scmp.ne.s32.totalorder %s2416_s4, %s2185_s6  ;;  %p2187_p0 = pneg %p2418_p11 }
  0x33   : > { %s2190_s9 = scalar_lea.hbm %s2640_s0, 16384  ;;  %p2191_p7 = scmp.lt.u32.totalorder %s2416_s4, %s2640_s0 }
  0x34   : > { %p2188_p3 = pnand %p2187_p0, %p2186_p13  ;;  %p2192_p9 = scmp.lt.u32.totalorder %s2190_s9, %s2185_s6 }
  0x35   : > { %p2194_p1 = scmp.lt.u32.totalorder %s2185_s6, %s2416_s4 }
  0x36   : > { %p2189_p5 = pneg %p2188_p3  ;;  %p2193_p2 = por %p2192_p9, %p2191_p7 }
  0x38   : > { %p2195_p4 = por %p2194_p1, %p2193_p2 }
  0x3a   : > { %p2196_p6 = pnand %p2195_p4, %p2189_p5 }
  0x3c   : > { %2199 = shalt.err (!%p2196_p6)
}
  0x3d   : > { %s2200_s27 = scalar_lea.vmem %s2422_s25, 8192  ;;  %s2290_s28 = smov [#allocation2]  }
  0x3e   : > { %p2201_p8 = scmp.ne.s32.totalorder %s2422_s25, %s2200_s27  ;;  %s2205_s29 = sshll.u32 %s2290_s28, 4  ;;  %s2206_s29 = int_to_ptr.vmem [resolvable:$false] %s2205_s29 }
  0x3f   : > { %s2207_s23 = scalar_lea.vmem %s2206_s29, 16384  ;;  %p2208_p3 = scmp.lt.s32.totalorder %s2422_s25, %s2206_s29 }
  0x40   : > { %p2203_p10 = pnand %p2201_p8, %p2187_p0  ;;  %p2209_p7 = scmp.lt.s32.totalorder %s2207_s23, %s2200_s27 }
  0x42   : > { %p2204_p13 = pneg %p2203_p10  ;;  %p2210_p9 = por %p2209_p7, %p2208_p3 }
  0x44   : > { %p2211_p2 = pnand %p2210_p9, %p2204_p13 }
  0x46   : > { %2214 = shalt.err (!%p2211_p2)
}
  0x47   : > { %s2291_s30 = smov 256   ;;  %s2292_s22 = smov 16  }
  0x48   : > { %1981 = dma.hbm_to_vmem [thread:$0]  (!%p2418_p11), %s2416_s4, 8192, %s2422_s25, %s2424_s5, %s2291_s30, %s2291_s30, %s2292_s22  }
  0x49   : > { %p2654_p0 = scmp.ne.s32.totalorder %s2649_s20, 0 }
  0x4a   : > { %s2455_s6 = sand.u32 (!%p2654_p0), 1, %s2277_s13   ;;  %p2655_p5 = scmp.ne.s32.totalorder (!%p2654_p0), %s2647_s18, 0 }
  0x4b   : > { %172 = sbr.rel (%p2654_p0) target bundleno = 480 (0x1e0), region = 32  ;;  %s1475_s7 = sshll.u32 (!%p2654_p0), %s2455_s6, 9 }
  0x4c   : > { %s175_s8 = scalar_lea.sflag (!%p2654_p0), [#allocation3], %s2455_s6  ;;  %s2459_s9 = scalar_lea.vmem (!%p2654_p0), [#allocation2], %s1475_s7 }
  0x52   : > { %2260 = dma.done.wait (%p2655_p5), %s175_s8, 8192  }
  0x53   : > { %2262 = vsyncadd (%p2655_p5), %s175_s8, 4294959104  ;;  %p2656_p11 = scmp.eq.s32.totalorder %s2337_s16, 0 }
  0x55   : > { %2264 = dma.done.wait (%p2656_p11), [#allocation6], 4096   ;;  %p2657_p1 = pmov %p2656_p11 }
  0x56   : > { %v2029_v0 = vld [vmem:[#allocation5 + $0x40] sm:$0xff]   ;;  %v2033_v4 = vld [vmem:[#allocation5 + $0x48] sm:$0xff]   ;;  %v2037_v8 = vld [vmem:[#allocation5 + $0x50] sm:$0xff]   ;;  %s1477_s4 = sshll.u32 %s2455_s6, 7  ;;  %s1646_s26 = sshll.u32 %s2337_s16, 11 }
  0x57   : > { %2266 = vsyncadd (%p2657_p1), [#allocation6], 4294963200  ;;  %v2030_v1 = vld [vmem:[#allocation5 + $0xc0] sm:$0xff]   ;;  %1742 = vmatprep.subr.bf16.mxu0 %v2029_v0  ;;  %v2034_v5 = vld [vmem:[#allocation5 + $0xc8] sm:$0xff]   ;;  %s2542_s25 = scalar_lea.vmem [#allocation7], %s1477_s4  ;;  %s2593_s27 = scalar_lea.hbm %s2643_s3, %s1646_s26 }
  0x58   : > { %v2031_v2 = vld [vmem:[#allocation5] sm:$0xff]   ;;  %1854 = vmatprep.subr.bf16.mxu1 %v2030_v1  ;;  %v2035_v6 = vld [vmem:[#allocation5 + $0x8] sm:$0xff]   ;;  %v2038_v9 = vld [vmem:[#allocation5 + $0xd0] sm:$0xff]   ;;  %s1383_s5 = sshll.u32 %s2542_s25, 4  ;;  %s1370_s28 = scalar_lea.sflag [#allocation4], %s2455_s6  ;;  %s2595_s5 = int_to_ptr.vmem [resolvable:$true] %s1383_s5 }
  0x59   : > { %v2032_v3 = vld [vmem:[#allocation5 + $0x80] sm:$0xff]   ;;  %1743 = vmatpush3.bf16.msra.mxu0 %v2031_v2  ;;  %v2036_v7 = vld [vmem:[#allocation5 + $0x88] sm:$0xff]   ;;  %v2039_v10 = vld [vmem:[#allocation5 + $0x10] sm:$0xff]   ;;  %s2215_s29 = scalar_lea.vmem %s2595_s5, 2048  ;;  %s2293_s16 = smov [#allocation7]  }
  0x5a   : > { %1855 = vmatpush3.bf16.msra.mxu1 %v2032_v3  ;;  %1744 = vmatprep.subr.bf16.mxu0 %v2033_v4  ;;  %v2040_v11 = vld [vmem:[#allocation5 + $0x90] sm:$0xff]   ;;  %v2041_v12 = vld [vmem:[#allocation5 + $0x58] sm:$0xff]   ;;  %v2045_v16 = vld [vmem:[#allocation5 + $0x60] sm:$0xff]   ;;  %p2216_p4 = scmp.ne.s32.totalorder %s2595_s5, %s2215_s29  ;;  %s2219_s23 = sshll.u32 %s2293_s16, 4  ;;  %s2220_s23 = int_to_ptr.vmem [resolvable:$false] %s2219_s23 }
  0x5b   : > { %1856 = vmatprep.subr.bf16.mxu1 %v2034_v5  ;;  %v2042_v13 = vld [vmem:[#allocation5 + $0xd8] sm:$0xff]   ;;  %v2046_v17 = vld [vmem:[#allocation5 + $0xe0] sm:$0xff]   ;;  %v2049_v20 = vld [vmem:[#allocation5 + $0x68] sm:$0xff]   ;;  %s2221_s30 = scalar_lea.vmem %s2220_s23, 4096  ;;  %p2222_p10 = scmp.lt.s32.totalorder %s2595_s5, %s2220_s23 }
  0x5c   : > { %v2043_v14 = vld [vmem:[#allocation5 + $0x18] sm:$0xff]   ;;  %v2047_v18 = vld [vmem:[#allocation5 + $0x20] sm:$0xff]   ;;  %v2050_v21 = vld [vmem:[#allocation5 + $0xe8] sm:$0xff]   ;;  %p2217_p6 = pnand %p2216_p4, %p2407_p12  ;;  %p2223_p13 = scmp.lt.s32.totalorder %s2221_s30, %s2215_s29 }
  0x5d   : > { %1745 = vmatpush3.bf16.msra.mxu0 %v2035_v6  ;;  %v2044_v15 = vld [vmem:[#allocation5 + $0x98] sm:$0xff]   ;;  %v2048_v19 = vld [vmem:[#allocation5 + $0xa0] sm:$0xff]   ;;  %v2051_v22 = vld [vmem:[#allocation5 + $0x28] sm:$0xff]  }
  0x5e   : > { %1857 = vmatpush3.bf16.msra.mxu1 %v2036_v7  ;;  %1746 = vmatprep.subr.bf16.mxu0 %v2037_v8  ;;  %v2052_v23 = vld [vmem:[#allocation5 + $0xa8] sm:$0xff]   ;;  %v2053_v24 = vld [vmem:[#allocation5 + $0x70] sm:$0xff]   ;;  %v2057_v28 = vld [vmem:[#allocation5 + $0x78] sm:$0xff]   ;;  %p2218_p8 = pneg %p2217_p6  ;;  %p2224_p3 = por %p2223_p13, %p2222_p10 }
  0x5f   : > { %1858 = vmatprep.subr.bf16.mxu1 %v2038_v9  ;;  %v2054_v25 = vld [vmem:[#allocation5 + $0xf0] sm:$0xff]   ;;  %v2058_v29 = vld [vmem:[#allocation5 + $0xf8] sm:$0xff]  }
  0x60   : > { %v2055_v26 = vld [vmem:[#allocation5 + $0x30] sm:$0xff]   ;;  %v2059_v30 = vld [vmem:[#allocation5 + $0x38] sm:$0xff]   ;;  %p2225_p7 = pnand %p2224_p3, %p2218_p8 }
  0x61   : > { %1747 = vmatpush3.bf16.msra.mxu0 %v2039_v10  ;;  %v2056_v27 = vld [vmem:[#allocation5 + $0xb0] sm:$0xff]   ;;  %v2060_v31 = vld [vmem:[#allocation5 + $0xb8] sm:$0xff]  }
  0x62   : > { %1859 = vmatpush3.bf16.msra.mxu1 %v2040_v11  ;;  %1748 = vmatprep.subr.bf16.mxu0 %v2041_v12  ;;  %v2061_v32 = vld [vmem:[%s2459_s9] ss:$16 sps:$4 sm:$0xff]   ;;  %v2063_v33 = vld [vmem:[%s2459_s9 + $0x4] ss:$16 sps:$4 sm:$0xff]   ;;  %v2064_v34 = vld [vmem:[%s2459_s9 + $0x8] ss:$16 sps:$4 sm:$0xff]  }
  0x63   : > { %1860 = vmatprep.subr.bf16.mxu1 %v2042_v13  ;;  %v2066_v35 = vld [vmem:[%s2459_s9 + $0xc] ss:$16 sps:$4 sm:$0xff]   ;;  %887 = vmatprep.mubr.bf16.mxu0 %v2063_v33  ;;  %v2067_v36 = vld [vmem:[%s2459_s9 + $0x24] ss:$16 sps:$4 sm:$0xff]   ;;  %v2071_v38 = vld [vmem:[%s2459_s9 + $0x20] ss:$16 sps:$4 sm:$0xff]  }
  0x64   : > { %1048 = vmatprep.mubr.bf16.mxu1 %v2066_v35  ;;  %v2069_v37 = vld [vmem:[%s2459_s9 + $0x2c] ss:$16 sps:$4 sm:$0xff]   ;;  %v2072_v39 = vld [vmem:[%s2459_s9 + $0x28] ss:$16 sps:$4 sm:$0xff]   ;;  %v2073_v40 = vld [vmem:[%s2459_s9 + $0x44] ss:$16 sps:$4 sm:$0xff]  }
  0x65   : > { %1749 = vmatpush3.bf16.msra.mxu0 %v2043_v14  ;;  %v2075_v41 = vld [vmem:[%s2459_s9 + $0x4c] ss:$16 sps:$4 sm:$0xff]   ;;  %v2077_v42 = vld [vmem:[%s2459_s9 + $0x40] ss:$16 sps:$4 sm:$0xff]   ;;  %v2078_v43 = vld [vmem:[%s2459_s9 + $0x48] ss:$16 sps:$4 sm:$0xff]  }
  0x66   : > { %1861 = vmatpush3.bf16.msra.mxu1 %v2044_v15  ;;  %1750 = vmatprep.subr.bf16.mxu0 %v2045_v16  ;;  %v2079_v44 = vld [vmem:[%s2459_s9 + $0x64] ss:$16 sps:$4 sm:$0xff]   ;;  %v2081_v45 = vld [vmem:[%s2459_s9 + $0x6c] ss:$16 sps:$4 sm:$0xff]   ;;  %v2083_v46 = vld [vmem:[%s2459_s9 + $0x60] ss:$16 sps:$4 sm:$0xff]  }
  0x67   : > { %1862 = vmatprep.subr.bf16.mxu1 %v2046_v17  ;;  %v2084_v47 = vld [vmem:[%s2459_s9 + $0x68] ss:$16 sps:$4 sm:$0xff]   ;;  %v2085_v48 = vld [vmem:[%s2459_s9 + $0x84] ss:$16 sps:$4 sm:$0xff]   ;;  %v2087_v49 = vld [vmem:[%s2459_s9 + $0x8c] ss:$16 sps:$4 sm:$0xff]  }
  0x68   : > { %v2089_v50 = vld [vmem:[%s2459_s9 + $0x80] ss:$16 sps:$4 sm:$0xff]   ;;  %v2090_v51 = vld [vmem:[%s2459_s9 + $0x88] ss:$16 sps:$4 sm:$0xff]   ;;  %v2091_v52 = vld [vmem:[%s2459_s9 + $0xa4] ss:$16 sps:$4 sm:$0xff]  }
  0x69   : > { %1751 = vmatpush3.bf16.msra.mxu0 %v2047_v18  ;;  %v2093_v53 = vld [vmem:[%s2459_s9 + $0xac] ss:$16 sps:$4 sm:$0xff]   ;;  %v2095_v54 = vld [vmem:[%s2459_s9 + $0xa0] ss:$16 sps:$4 sm:$0xff]   ;;  %v2096_v55 = vld [vmem:[%s2459_s9 + $0xa8] ss:$16 sps:$4 sm:$0xff]  }
  0x6a   : > { %1863 = vmatpush3.bf16.msra.mxu1 %v2048_v19  ;;  %1752 = vmatprep.subr.bf16.mxu0 %v2049_v20  ;;  %v2097_v56 = vld [vmem:[%s2459_s9 + $0xc4] ss:$16 sps:$4 sm:$0xff]   ;;  %v2099_v57 = vld [vmem:[%s2459_s9 + $0xcc] ss:$16 sps:$4 sm:$0xff]   ;;  %v2101_v58 = vld [vmem:[%s2459_s9 + $0xc0] ss:$16 sps:$4 sm:$0xff]  }
  0x6b   : > { %1864 = vmatprep.subr.bf16.mxu1 %v2050_v21  ;;  %v2102_v59 = vld [vmem:[%s2459_s9 + $0xc8] ss:$16 sps:$4 sm:$0xff]   ;;  %v2103_v60 = vld [vmem:[%s2459_s9 + $0xe4] ss:$16 sps:$4 sm:$0xff]   ;;  %v2105_v61 = vld [vmem:[%s2459_s9 + $0xec] ss:$16 sps:$4 sm:$0xff]  }
  0x6c   : > { %v2107_v62 = vld [vmem:[%s2459_s9 + $0xe0] ss:$16 sps:$4 sm:$0xff]   ;;  %v2108_v63 = vld [vmem:[%s2459_s9 + $0xe8] ss:$16 sps:$4 sm:$0xff]   ;;  %v2109_v0 = vld [vmem:[%s2459_s9 + $0x104] ss:$16 sps:$4 sm:$0xff]  }
  0x6d   : > { %1753 = vmatpush3.bf16.msra.mxu0 %v2051_v22  ;;  %v2111_v1 = vld [vmem:[%s2459_s9 + $0x10c] ss:$16 sps:$4 sm:$0xff]   ;;  %v2113_v2 = vld [vmem:[%s2459_s9 + $0x100] ss:$16 sps:$4 sm:$0xff]   ;;  %v2114_v3 = vld [vmem:[%s2459_s9 + $0x108] ss:$16 sps:$4 sm:$0xff]  }
  0x6e   : > { %1865 = vmatpush3.bf16.msra.mxu1 %v2052_v23  ;;  %1754 = vmatprep.subr.bf16.mxu0 %v2053_v24  ;;  %v2115_v4 = vld [vmem:[%s2459_s9 + $0x124] ss:$16 sps:$4 sm:$0xff]   ;;  %v2117_v5 = vld [vmem:[%s2459_s9 + $0x12c] ss:$16 sps:$4 sm:$0xff]   ;;  %v2119_v6 = vld [vmem:[%s2459_s9 + $0x120] ss:$16 sps:$4 sm:$0xff]  }
  0x6f   : > { %1866 = vmatprep.subr.bf16.mxu1 %v2054_v25  ;;  %v2120_v7 = vld [vmem:[%s2459_s9 + $0x128] ss:$16 sps:$4 sm:$0xff]   ;;  %v2121_v8 = vld [vmem:[%s2459_s9 + $0x144] ss:$16 sps:$4 sm:$0xff]   ;;  %v2123_v9 = vld [vmem:[%s2459_s9 + $0x14c] ss:$16 sps:$4 sm:$0xff]  }
  0x70   : > { %v2125_v10 = vld [vmem:[%s2459_s9 + $0x140] ss:$16 sps:$4 sm:$0xff]   ;;  %v2126_v11 = vld [vmem:[%s2459_s9 + $0x148] ss:$16 sps:$4 sm:$0xff]   ;;  %v2127_v12 = vld [vmem:[%s2459_s9 + $0x164] ss:$16 sps:$4 sm:$0xff]  }
  0x71   : > { %1755 = vmatpush3.bf16.msra.mxu0 %v2055_v26  ;;  %v2129_v13 = vld [vmem:[%s2459_s9 + $0x16c] ss:$16 sps:$4 sm:$0xff]   ;;  %v2131_v14 = vld [vmem:[%s2459_s9 + $0x160] ss:$16 sps:$4 sm:$0xff]   ;;  %v2132_v15 = vld [vmem:[%s2459_s9 + $0x168] ss:$16 sps:$4 sm:$0xff]  }
  0x72   : > { %1867 = vmatpush3.bf16.msra.mxu1 %v2056_v27  ;;  %1756 = vmatprep.subr.bf16.mxu0 %v2057_v28  ;;  %v2133_v16 = vld [vmem:[%s2459_s9 + $0x184] ss:$16 sps:$4 sm:$0xff]   ;;  %v2135_v17 = vld [vmem:[%s2459_s9 + $0x18c] ss:$16 sps:$4 sm:$0xff]   ;;  %v2137_v18 = vld [vmem:[%s2459_s9 + $0x180] ss:$16 sps:$4 sm:$0xff]  }
  0x73   : > { %1868 = vmatprep.subr.bf16.mxu1 %v2058_v29  ;;  %v2138_v19 = vld [vmem:[%s2459_s9 + $0x188] ss:$16 sps:$4 sm:$0xff]   ;;  %v2139_v20 = vld [vmem:[%s2459_s9 + $0x1a4] ss:$16 sps:$4 sm:$0xff]   ;;  %v2141_v21 = vld [vmem:[%s2459_s9 + $0x1ac] ss:$16 sps:$4 sm:$0xff]  }
  0x74   : > { %v2143_v22 = vld [vmem:[%s2459_s9 + $0x1a0] ss:$16 sps:$4 sm:$0xff]   ;;  %v2144_v23 = vld [vmem:[%s2459_s9 + $0x1a8] ss:$16 sps:$4 sm:$0xff]   ;;  %v2145_v24 = vld [vmem:[%s2459_s9 + $0x1c4] ss:$16 sps:$4 sm:$0xff]  }
  0x75   : > { %1757 = vmatpush3.bf16.msra.mxu0 %v2059_v30  ;;  %v2147_v25 = vld [vmem:[%s2459_s9 + $0x1cc] ss:$16 sps:$4 sm:$0xff]   ;;  %v2149_v26 = vld [vmem:[%s2459_s9 + $0x1c0] ss:$16 sps:$4 sm:$0xff]   ;;  %v2150_v27 = vld [vmem:[%s2459_s9 + $0x1c8] ss:$16 sps:$4 sm:$0xff]  }
  0x76   : > { %1869 = vmatpush3.bf16.msra.mxu1 %v2060_v31  ;;  %v2151_v28 = vld [vmem:[%s2459_s9 + $0x1e4] ss:$16 sps:$4 sm:$0xff]   ;;  %v2153_v29 = vld [vmem:[%s2459_s9 + $0x1ec] ss:$16 sps:$4 sm:$0xff]   ;;  %v2155_v30 = vld [vmem:[%s2459_s9 + $0x1e0] ss:$16 sps:$4 sm:$0xff]  }
  0x77   : > { %v2156_v31 = vld [vmem:[%s2459_s9 + $0x1e8] ss:$16 sps:$4 sm:$0xff]  }
  0x78   : > { %888 = vmatmul.mubr.bf16.vlgmr.msra.gmra.mrb[0].mxu0 %v2061_v32 }
  0x79   : > { %1049 = vmatmul.mubr.bf16.vlgmr.msra.gmra.mrb[0].mxu1 %v2064_v34  ;;  %895 = vmatprep.mubr.bf16.mxu0 %v2067_v36  ;;  %v2536_v34 = vld [vmem:[%s2642_s2] ss:$0 sm:$0xff] }
  0x7a   : > { %1056 = vmatprep.mubr.bf16.mxu1 %v2069_v37 }
  0x80   : > { %896 = vmatmul.mubr.bf16.gmra.mrb[4].mxu0 %v2071_v38 }
  0x81   : > { %1057 = vmatmul.mubr.bf16.gmra.mrb[4].mxu1 %v2072_v39  ;;  %903 = vmatprep.mubr.bf16.mxu0 %v2073_v40 }
  0x82   : > { %1064 = vmatprep.mubr.bf16.mxu1 %v2075_v41 }
  0x88   : > { %904 = vmatmul.mubr.bf16.gmra.mrb[8].mxu0 %v2077_v42 }
  0x89   : > { %1065 = vmatmul.mubr.bf16.gmra.mrb[8].mxu1 %v2078_v43  ;;  %911 = vmatprep.mubr.bf16.mxu0 %v2079_v44 }
  0x8a   : > { %1072 = vmatprep.mubr.bf16.mxu1 %v2081_v45 }
  0x90   : > { %912 = vmatmul.mubr.bf16.gmra.mrb[12].mxu0 %v2083_v46 }
  0x91   : > { %1073 = vmatmul.mubr.bf16.gmra.mrb[12].mxu1 %v2084_v47  ;;  %919 = vmatprep.mubr.bf16.mxu0 %v2085_v48 }
  0x92   : > { %1080 = vmatprep.mubr.bf16.mxu1 %v2087_v49 }
  0x98   : > { %920 = vmatmul.mubr.bf16.gmra.mrb[16].mxu0 %v2089_v50 }
  0x99   : > { %1081 = vmatmul.mubr.bf16.gmra.mrb[16].mxu1 %v2090_v51  ;;  %927 = vmatprep.mubr.bf16.mxu0 %v2091_v52 }
  0x9a   : > { %1088 = vmatprep.mubr.bf16.mxu1 %v2093_v53 }
  0xa0   : > { %928 = vmatmul.mubr.bf16.gmra.mrb[20].mxu0 %v2095_v54 }
  0xa1   : > { %1089 = vmatmul.mubr.bf16.gmra.mrb[20].mxu1 %v2096_v55  ;;  %935 = vmatprep.mubr.bf16.mxu0 %v2097_v56 }
  0xa2   : > { %1096 = vmatprep.mubr.bf16.mxu1 %v2099_v57 }
  0xa8   : > { %936 = vmatmul.mubr.bf16.gmra.mrb[24].mxu0 %v2101_v58 }
  0xa9   : > { %1097 = vmatmul.mubr.bf16.gmra.mrb[24].mxu1 %v2102_v59  ;;  %943 = vmatprep.mubr.bf16.mxu0 %v2103_v60 }
  0xaa   : > { %1104 = vmatprep.mubr.bf16.mxu1 %v2105_v61 }
  0xb0   : > { %944 = vmatmul.mubr.bf16.gmra.mrb[28].mxu0 %v2107_v62 }
  0xb1   : > { %1105 = vmatmul.mubr.bf16.gmra.mrb[28].mxu1 %v2108_v63  ;;  %951 = vmatprep.mubr.bf16.mxu0 %v2109_v0 }
  0xb2   : > { %1112 = vmatprep.mubr.bf16.mxu1 %v2111_v1 }
  0xb8   : > { %952 = vmatmul.mubr.bf16.gmra.mrb[32].mxu0 %v2113_v2 }
  0xb9   : > { %1113 = vmatmul.mubr.bf16.gmra.mrb[32].mxu1 %v2114_v3  ;;  %959 = vmatprep.mubr.bf16.mxu0 %v2115_v4 }
  0xba   : > { %1120 = vmatprep.mubr.bf16.mxu1 %v2117_v5 }
  0xc0   : > { %960 = vmatmul.mubr.bf16.gmra.mrb[36].mxu0 %v2119_v6 }
  0xc1   : > { %1121 = vmatmul.mubr.bf16.gmra.mrb[36].mxu1 %v2120_v7  ;;  %967 = vmatprep.mubr.bf16.mxu0 %v2121_v8 }
  0xc2   : > { %1128 = vmatprep.mubr.bf16.mxu1 %v2123_v9 }
  0xc8   : > { %968 = vmatmul.mubr.bf16.gmra.mrb[40].mxu0 %v2125_v10 }
  0xc9   : > { %1129 = vmatmul.mubr.bf16.gmra.mrb[40].mxu1 %v2126_v11  ;;  %975 = vmatprep.mubr.bf16.mxu0 %v2127_v12 }
  0xca   : > { %1136 = vmatprep.mubr.bf16.mxu1 %v2129_v13 }
  0xd0   : > { %976 = vmatmul.mubr.bf16.gmra.mrb[44].mxu0 %v2131_v14 }
  0xd1   : > { %1137 = vmatmul.mubr.bf16.gmra.mrb[44].mxu1 %v2132_v15  ;;  %983 = vmatprep.mubr.bf16.mxu0 %v2133_v16 }
  0xd2   : > { %1144 = vmatprep.mubr.bf16.mxu1 %v2135_v17 }
  0xd8   : > { %984 = vmatmul.mubr.bf16.gmra.mrb[48].mxu0 %v2137_v18 }
  0xd9   : > { %1145 = vmatmul.mubr.bf16.gmra.mrb[48].mxu1 %v2138_v19  ;;  %991 = vmatprep.mubr.bf16.mxu0 %v2139_v20 }
  0xda   : > { %1152 = vmatprep.mubr.bf16.mxu1 %v2141_v21 }
  0xe0   : > { %992 = vmatmul.mubr.bf16.gmra.mrb[52].mxu0 %v2143_v22 }
  0xe1   : > { %1153 = vmatmul.mubr.bf16.gmra.mrb[52].mxu1 %v2144_v23  ;;  %999 = vmatprep.mubr.bf16.mxu0 %v2145_v24 }
  0xe2   : > { %1160 = vmatprep.mubr.bf16.mxu1 %v2147_v25 }
  0xe8   : > { %1000 = vmatmul.mubr.bf16.gmra.mrb[56].mxu0 %v2149_v26 }
  0xe9   : > { %1161 = vmatmul.mubr.bf16.gmra.mrb[56].mxu1 %v2150_v27  ;;  %1007 = vmatprep.mubr.bf16.mxu0 %v2151_v28 }
  0xea   : > { %1168 = vmatprep.mubr.bf16.mxu1 %v2153_v29 }
  0xf0   : > { %1008 = vmatmul.mubr.bf16.gmra.mrb[60].mxu0 %v2155_v30 }
  0xf1   : > { %1169 = vmatmul.mubr.bf16.gmra.mrb[60].mxu1 %v2156_v31 }
 0x14b   : > { %v1758_v32 = vpop.f32.mrb[0].mxu0 }
 0x14c   : > { %v1870_v33 = vpop.f32.mrb[0].mxu1  ;;  %v1759_v35 = vpop.f32.mrb[1].mxu0 }
 0x14d   : > { %v1760_v36 = vadd.f32 %v1759_v35, %v1758_v32  ;;  %v1871_v37 = vpop.f32.mrb[1].mxu1  ;;  %v1761_v38 = vpop.f32.mrb[2].mxu0 }
 0x14e   : > { %v1872_v39 = vadd.f32 %v1871_v37, %v1870_v33  ;;  %v1873_v40 = vpop.f32.mrb[2].mxu1  ;;  %v1762_v41 = vpop.f32.mrb[3].mxu0 }
 0x14f   : > { %v890_v42 = vadd.f32 %v1760_v36, %v2536_v34  ;;  %v1763_v43 = vadd.f32 %v1762_v41, %v1761_v38  ;;  %v1874_v44 = vpop.f32.mrb[3].mxu1 }
 0x150   : > { %v1875_v45 = vadd.f32 %v1874_v44, %v1873_v40 }
 0x151   : > { %v1051_v46 = vadd.f32 %v1872_v39, %v890_v42  ;;  %v893_v47 = vadd.f32 %v1763_v43, %v2536_v34 }
 0x153   : > { %v1054_v48 = vadd.f32 %v1875_v45, %v893_v47  ;;  %v1764_v49 = vpop.f32.mrb[4].mxu0  ;;  %v1177_v52 = vmax.f32 %v1051_v46, 0.0 }
 0x154   : > { %v1876_v50 = vpop.f32.mrb[4].mxu1  ;;  %v1765_v51 = vpop.f32.mrb[5].mxu0 }
 0x155   : > { %v1178_v53 = vmax.f32 %v1054_v48, 0.0  ;;  %v1766_v54 = vadd.f32 %v1765_v51, %v1764_v49  ;;  %v1877_v55 = vpop.f32.mrb[5].mxu1  ;;  %v1767_v56 = vpop.f32.mrb[6].mxu0 }
 0x156   : > { %v1878_v57 = vadd.f32 %v1877_v55, %v1876_v50  ;;  %v1879_v58 = vpop.f32.mrb[6].mxu1  ;;  %v1768_v59 = vpop.f32.mrb[7].mxu0 }
 0x157   : > { %v1650_v60 = vpack.c.bf16 %v1178_v53, %v1177_v52  ;;  %v898_v61 = vadd.f32 %v1766_v54, %v2536_v34  ;;  %v1769_v62 = vadd.f32 %v1768_v59, %v1767_v56  ;;  %v1880_v63 = vpop.f32.mrb[7].mxu1 }
 0x158   : > { %v1881_v0 = vadd.f32 %v1880_v63, %v1879_v58 }
 0x159   : > { %1651 = vst [vmem:[%s2542_s25] sm:$0xff] %v1650_v60   ;;  %v1059_v1 = vadd.f32 %v1878_v57, %v898_v61  ;;  %v901_v2 = vadd.f32 %v1769_v62, %v2536_v34 }
 0x15b   : > { %v1062_v3 = vadd.f32 %v1881_v0, %v901_v2  ;;  %v1770_v4 = vpop.f32.mrb[8].mxu0  ;;  %v1179_v7 = vmax.f32 %v1059_v1, 0.0 }
 0x15c   : > { %v1882_v5 = vpop.f32.mrb[8].mxu1  ;;  %v1771_v6 = vpop.f32.mrb[9].mxu0 }
 0x15d   : > { %v1180_v8 = vmax.f32 %v1062_v3, 0.0  ;;  %v1772_v9 = vadd.f32 %v1771_v6, %v1770_v4  ;;  %v1883_v10 = vpop.f32.mrb[9].mxu1  ;;  %v1773_v11 = vpop.f32.mrb[10].mxu0 }
 0x15e   : > { %v1884_v12 = vadd.f32 %v1883_v10, %v1882_v5  ;;  %v1885_v13 = vpop.f32.mrb[10].mxu1  ;;  %v1774_v14 = vpop.f32.mrb[11].mxu0 }
 0x15f   : > { %v1655_v15 = vpack.c.bf16 %v1180_v8, %v1179_v7  ;;  %v906_v16 = vadd.f32 %v1772_v9, %v2536_v34  ;;  %v1775_v17 = vadd.f32 %v1774_v14, %v1773_v11  ;;  %v1886_v18 = vpop.f32.mrb[11].mxu1 }
 0x160   : > { %v1887_v19 = vadd.f32 %v1886_v18, %v1885_v13 }
 0x161   : > { %1727 = vst [vmem:[%s2542_s25 + $0x8] sm:$0xff] %v1655_v15   ;;  %v1067_v20 = vadd.f32 %v1884_v12, %v906_v16  ;;  %v909_v21 = vadd.f32 %v1775_v17, %v2536_v34 }
 0x163   : > { %v1070_v22 = vadd.f32 %v1887_v19, %v909_v21  ;;  %v1776_v23 = vpop.f32.mrb[12].mxu0  ;;  %v1181_v26 = vmax.f32 %v1067_v20, 0.0 }
 0x164   : > { %v1888_v24 = vpop.f32.mrb[12].mxu1  ;;  %v1777_v25 = vpop.f32.mrb[13].mxu0 }
 0x165   : > { %v1182_v27 = vmax.f32 %v1070_v22, 0.0  ;;  %v1778_v28 = vadd.f32 %v1777_v25, %v1776_v23  ;;  %v1889_v29 = vpop.f32.mrb[13].mxu1  ;;  %v1779_v30 = vpop.f32.mrb[14].mxu0 }
 0x166   : > { %v1890_v31 = vadd.f32 %v1889_v29, %v1888_v24  ;;  %v1891_v32 = vpop.f32.mrb[14].mxu1  ;;  %v1780_v33 = vpop.f32.mrb[15].mxu0 }
 0x167   : > { %v1660_v35 = vpack.c.bf16 %v1182_v27, %v1181_v26  ;;  %v914_v36 = vadd.f32 %v1778_v28, %v2536_v34  ;;  %v1781_v37 = vadd.f32 %v1780_v33, %v1779_v30  ;;  %v1892_v38 = vpop.f32.mrb[15].mxu1 }
 0x168   : > { %v1893_v39 = vadd.f32 %v1892_v38, %v1891_v32 }
 0x169   : > { %1728 = vst [vmem:[%s2542_s25 + $0x10] sm:$0xff] %v1660_v35   ;;  %v1075_v40 = vadd.f32 %v1890_v31, %v914_v36  ;;  %v917_v41 = vadd.f32 %v1781_v37, %v2536_v34 }
 0x16b   : > { %v1078_v42 = vadd.f32 %v1893_v39, %v917_v41  ;;  %v1782_v43 = vpop.f32.mrb[16].mxu0  ;;  %v1183_v46 = vmax.f32 %v1075_v40, 0.0 }
 0x16c   : > { %v1894_v44 = vpop.f32.mrb[16].mxu1  ;;  %v1783_v45 = vpop.f32.mrb[17].mxu0 }
 0x16d   : > { %v1184_v47 = vmax.f32 %v1078_v42, 0.0  ;;  %v1784_v48 = vadd.f32 %v1783_v45, %v1782_v43  ;;  %v1895_v49 = vpop.f32.mrb[17].mxu1  ;;  %v1785_v50 = vpop.f32.mrb[18].mxu0 }
 0x16e   : > { %v1896_v51 = vadd.f32 %v1895_v49, %v1894_v44  ;;  %v1897_v52 = vpop.f32.mrb[18].mxu1  ;;  %v1786_v53 = vpop.f32.mrb[19].mxu0 }
 0x16f   : > { %v1665_v54 = vpack.c.bf16 %v1184_v47, %v1183_v46  ;;  %v922_v55 = vadd.f32 %v1784_v48, %v2536_v34  ;;  %v1787_v56 = vadd.f32 %v1786_v53, %v1785_v50  ;;  %v1898_v57 = vpop.f32.mrb[19].mxu1 }
 0x170   : > { %v1899_v58 = vadd.f32 %v1898_v57, %v1897_v52 }
 0x171   : > { %1729 = vst [vmem:[%s2542_s25 + $0x18] sm:$0xff] %v1665_v54   ;;  %v1083_v59 = vadd.f32 %v1896_v51, %v922_v55  ;;  %v925_v60 = vadd.f32 %v1787_v56, %v2536_v34 }
 0x173   : > { %v1086_v61 = vadd.f32 %v1899_v58, %v925_v60  ;;  %v1788_v62 = vpop.f32.mrb[20].mxu0  ;;  %v1185_v1 = vmax.f32 %v1083_v59, 0.0 }
 0x174   : > { %v1900_v63 = vpop.f32.mrb[20].mxu1  ;;  %v1789_v0 = vpop.f32.mrb[21].mxu0 }
 0x175   : > { %v1186_v2 = vmax.f32 %v1086_v61, 0.0  ;;  %v1790_v3 = vadd.f32 %v1789_v0, %v1788_v62  ;;  %v1901_v4 = vpop.f32.mrb[21].mxu1  ;;  %v1791_v5 = vpop.f32.mrb[22].mxu0 }
 0x176   : > { %v1902_v6 = vadd.f32 %v1901_v4, %v1900_v63  ;;  %v1903_v7 = vpop.f32.mrb[22].mxu1  ;;  %v1792_v8 = vpop.f32.mrb[23].mxu0 }
 0x177   : > { %v1670_v9 = vpack.c.bf16 %v1186_v2, %v1185_v1  ;;  %v930_v10 = vadd.f32 %v1790_v3, %v2536_v34  ;;  %v1793_v11 = vadd.f32 %v1792_v8, %v1791_v5  ;;  %v1904_v12 = vpop.f32.mrb[23].mxu1 }
 0x178   : > { %v1905_v13 = vadd.f32 %v1904_v12, %v1903_v7 }
 0x179   : > { %1730 = vst [vmem:[%s2542_s25 + $0x20] sm:$0xff] %v1670_v9   ;;  %v1091_v14 = vadd.f32 %v1902_v6, %v930_v10  ;;  %v933_v15 = vadd.f32 %v1793_v11, %v2536_v34 }
 0x17b   : > { %v1094_v16 = vadd.f32 %v1905_v13, %v933_v15  ;;  %v1794_v17 = vpop.f32.mrb[24].mxu0  ;;  %v1187_v20 = vmax.f32 %v1091_v14, 0.0 }
 0x17c   : > { %v1906_v18 = vpop.f32.mrb[24].mxu1  ;;  %v1795_v19 = vpop.f32.mrb[25].mxu0 }
 0x17d   : > { %v1188_v21 = vmax.f32 %v1094_v16, 0.0  ;;  %v1796_v22 = vadd.f32 %v1795_v19, %v1794_v17  ;;  %v1907_v23 = vpop.f32.mrb[25].mxu1  ;;  %v1797_v24 = vpop.f32.mrb[26].mxu0 }
 0x17e   : > { %v1908_v25 = vadd.f32 %v1907_v23, %v1906_v18  ;;  %v1909_v26 = vpop.f32.mrb[26].mxu1  ;;  %v1798_v27 = vpop.f32.mrb[27].mxu0 }
 0x17f   : > { %v1675_v28 = vpack.c.bf16 %v1188_v21, %v1187_v20  ;;  %v938_v29 = vadd.f32 %v1796_v22, %v2536_v34  ;;  %v1799_v30 = vadd.f32 %v1798_v27, %v1797_v24  ;;  %v1910_v31 = vpop.f32.mrb[27].mxu1 }
 0x180   : > { %v1911_v32 = vadd.f32 %v1910_v31, %v1909_v26 }
 0x181   : > { %1731 = vst [vmem:[%s2542_s25 + $0x28] sm:$0xff] %v1675_v28   ;;  %v1099_v33 = vadd.f32 %v1908_v25, %v938_v29  ;;  %v941_v35 = vadd.f32 %v1799_v30, %v2536_v34 }
 0x183   : > { %v1102_v36 = vadd.f32 %v1911_v32, %v941_v35  ;;  %v1800_v37 = vpop.f32.mrb[28].mxu0  ;;  %v1189_v40 = vmax.f32 %v1099_v33, 0.0 }
 0x184   : > { %v1912_v38 = vpop.f32.mrb[28].mxu1  ;;  %v1801_v39 = vpop.f32.mrb[29].mxu0 }
 0x185   : > { %v1190_v41 = vmax.f32 %v1102_v36, 0.0  ;;  %v1802_v42 = vadd.f32 %v1801_v39, %v1800_v37  ;;  %v1913_v43 = vpop.f32.mrb[29].mxu1  ;;  %v1803_v44 = vpop.f32.mrb[30].mxu0 }
 0x186   : > { %v1914_v45 = vadd.f32 %v1913_v43, %v1912_v38  ;;  %v1915_v46 = vpop.f32.mrb[30].mxu1  ;;  %v1804_v47 = vpop.f32.mrb[31].mxu0 }
 0x187   : > { %v1680_v48 = vpack.c.bf16 %v1190_v41, %v1189_v40  ;;  %v946_v49 = vadd.f32 %v1802_v42, %v2536_v34  ;;  %v1805_v50 = vadd.f32 %v1804_v47, %v1803_v44  ;;  %v1916_v51 = vpop.f32.mrb[31].mxu1 }
 0x188   : > { %v1917_v52 = vadd.f32 %v1916_v51, %v1915_v46 }
 0x189   : > { %1732 = vst [vmem:[%s2542_s25 + $0x30] sm:$0xff] %v1680_v48   ;;  %v1107_v53 = vadd.f32 %v1914_v45, %v946_v49  ;;  %v949_v54 = vadd.f32 %v1805_v50, %v2536_v34 }
 0x18b   : > { %v1110_v55 = vadd.f32 %v1917_v52, %v949_v54  ;;  %v1806_v56 = vpop.f32.mrb[32].mxu0  ;;  %v1191_v59 = vmax.f32 %v1107_v53, 0.0 }
 0x18c   : > { %v1918_v57 = vpop.f32.mrb[32].mxu1  ;;  %v1807_v58 = vpop.f32.mrb[33].mxu0 }
 0x18d   : > { %v1192_v60 = vmax.f32 %v1110_v55, 0.0  ;;  %v1808_v61 = vadd.f32 %v1807_v58, %v1806_v56  ;;  %v1919_v62 = vpop.f32.mrb[33].mxu1  ;;  %v1809_v63 = vpop.f32.mrb[34].mxu0 }
 0x18e   : > { %v1920_v0 = vadd.f32 %v1919_v62, %v1918_v57  ;;  %v1921_v1 = vpop.f32.mrb[34].mxu1  ;;  %v1810_v2 = vpop.f32.mrb[35].mxu0 }
 0x18f   : > { %v1685_v3 = vpack.c.bf16 %v1192_v60, %v1191_v59  ;;  %v954_v4 = vadd.f32 %v1808_v61, %v2536_v34  ;;  %v1811_v5 = vadd.f32 %v1810_v2, %v1809_v63  ;;  %v1922_v6 = vpop.f32.mrb[35].mxu1 }
 0x190   : > { %v1923_v7 = vadd.f32 %v1922_v6, %v1921_v1 }
 0x191   : > { %1733 = vst [vmem:[%s2542_s25 + $0x38] sm:$0xff] %v1685_v3   ;;  %v1115_v8 = vadd.f32 %v1920_v0, %v954_v4  ;;  %v957_v9 = vadd.f32 %v1811_v5, %v2536_v34 }
 0x193   : > { %v1118_v10 = vadd.f32 %v1923_v7, %v957_v9  ;;  %v1812_v11 = vpop.f32.mrb[36].mxu0  ;;  %v1193_v14 = vmax.f32 %v1115_v8, 0.0 }
 0x194   : > { %v1924_v12 = vpop.f32.mrb[36].mxu1  ;;  %v1813_v13 = vpop.f32.mrb[37].mxu0 }
 0x195   : > { %v1194_v15 = vmax.f32 %v1118_v10, 0.0  ;;  %v1814_v16 = vadd.f32 %v1813_v13, %v1812_v11  ;;  %v1925_v17 = vpop.f32.mrb[37].mxu1  ;;  %v1815_v18 = vpop.f32.mrb[38].mxu0 }
 0x196   : > { %v1926_v19 = vadd.f32 %v1925_v17, %v1924_v12  ;;  %v1927_v20 = vpop.f32.mrb[38].mxu1  ;;  %v1816_v21 = vpop.f32.mrb[39].mxu0 }
 0x197   : > { %v1690_v22 = vpack.c.bf16 %v1194_v15, %v1193_v14  ;;  %v962_v23 = vadd.f32 %v1814_v16, %v2536_v34  ;;  %v1817_v24 = vadd.f32 %v1816_v21, %v1815_v18  ;;  %v1928_v25 = vpop.f32.mrb[39].mxu1 }
 0x198   : > { %v1929_v26 = vadd.f32 %v1928_v25, %v1927_v20 }
 0x199   : > { %1734 = vst [vmem:[%s2542_s25 + $0x40] sm:$0xff] %v1690_v22   ;;  %v1123_v27 = vadd.f32 %v1926_v19, %v962_v23  ;;  %v965_v28 = vadd.f32 %v1817_v24, %v2536_v34 }
 0x19b   : > { %v1126_v29 = vadd.f32 %v1929_v26, %v965_v28  ;;  %v1818_v30 = vpop.f32.mrb[40].mxu0  ;;  %v1195_v33 = vmax.f32 %v1123_v27, 0.0 }
 0x19c   : > { %v1930_v31 = vpop.f32.mrb[40].mxu1  ;;  %v1819_v32 = vpop.f32.mrb[41].mxu0 }
 0x19d   : > { %v1196_v35 = vmax.f32 %v1126_v29, 0.0  ;;  %v1820_v36 = vadd.f32 %v1819_v32, %v1818_v30  ;;  %v1931_v37 = vpop.f32.mrb[41].mxu1  ;;  %v1821_v38 = vpop.f32.mrb[42].mxu0 }
 0x19e   : > { %v1932_v39 = vadd.f32 %v1931_v37, %v1930_v31  ;;  %v1933_v40 = vpop.f32.mrb[42].mxu1  ;;  %v1822_v41 = vpop.f32.mrb[43].mxu0 }
 0x19f   : > { %v1695_v42 = vpack.c.bf16 %v1196_v35, %v1195_v33  ;;  %v970_v43 = vadd.f32 %v1820_v36, %v2536_v34  ;;  %v1823_v44 = vadd.f32 %v1822_v41, %v1821_v38  ;;  %v1934_v45 = vpop.f32.mrb[43].mxu1 }
 0x1a0   : > { %v1935_v46 = vadd.f32 %v1934_v45, %v1933_v40 }
 0x1a1   : > { %1735 = vst [vmem:[%s2542_s25 + $0x48] sm:$0xff] %v1695_v42   ;;  %v1131_v47 = vadd.f32 %v1932_v39, %v970_v43  ;;  %v973_v48 = vadd.f32 %v1823_v44, %v2536_v34 }
 0x1a3   : > { %v1134_v49 = vadd.f32 %v1935_v46, %v973_v48  ;;  %v1824_v50 = vpop.f32.mrb[44].mxu0  ;;  %v1197_v53 = vmax.f32 %v1131_v47, 0.0 }
 0x1a4   : > { %v1936_v51 = vpop.f32.mrb[44].mxu1  ;;  %v1825_v52 = vpop.f32.mrb[45].mxu0 }
 0x1a5   : > { %v1198_v54 = vmax.f32 %v1134_v49, 0.0  ;;  %v1826_v55 = vadd.f32 %v1825_v52, %v1824_v50  ;;  %v1937_v56 = vpop.f32.mrb[45].mxu1  ;;  %v1827_v57 = vpop.f32.mrb[46].mxu0 }
 0x1a6   : > { %v1938_v58 = vadd.f32 %v1937_v56, %v1936_v51  ;;  %v1939_v59 = vpop.f32.mrb[46].mxu1  ;;  %v1828_v60 = vpop.f32.mrb[47].mxu0 }
 0x1a7   : > { %v1700_v61 = vpack.c.bf16 %v1198_v54, %v1197_v53  ;;  %v978_v62 = vadd.f32 %v1826_v55, %v2536_v34  ;;  %v1829_v63 = vadd.f32 %v1828_v60, %v1827_v57  ;;  %v1940_v0 = vpop.f32.mrb[47].mxu1 }
 0x1a8   : > { %v1941_v1 = vadd.f32 %v1940_v0, %v1939_v59 }
 0x1a9   : > { %1736 = vst [vmem:[%s2542_s25 + $0x50] sm:$0xff] %v1700_v61   ;;  %v1139_v2 = vadd.f32 %v1938_v58, %v978_v62  ;;  %v981_v3 = vadd.f32 %v1829_v63, %v2536_v34 }
 0x1ab   : > { %v1142_v4 = vadd.f32 %v1941_v1, %v981_v3  ;;  %v1830_v5 = vpop.f32.mrb[48].mxu0  ;;  %v1199_v8 = vmax.f32 %v1139_v2, 0.0 }
 0x1ac   : > { %v1942_v6 = vpop.f32.mrb[48].mxu1  ;;  %v1831_v7 = vpop.f32.mrb[49].mxu0 }
 0x1ad   : > { %v1200_v9 = vmax.f32 %v1142_v4, 0.0  ;;  %v1832_v10 = vadd.f32 %v1831_v7, %v1830_v5  ;;  %v1943_v11 = vpop.f32.mrb[49].mxu1  ;;  %v1833_v12 = vpop.f32.mrb[50].mxu0 }
 0x1ae   : > { %v1944_v13 = vadd.f32 %v1943_v11, %v1942_v6  ;;  %v1945_v14 = vpop.f32.mrb[50].mxu1  ;;  %v1834_v15 = vpop.f32.mrb[51].mxu0 }
 0x1af   : > { %v1705_v16 = vpack.c.bf16 %v1200_v9, %v1199_v8  ;;  %v986_v17 = vadd.f32 %v1832_v10, %v2536_v34  ;;  %v1835_v18 = vadd.f32 %v1834_v15, %v1833_v12  ;;  %v1946_v19 = vpop.f32.mrb[51].mxu1 }
 0x1b0   : > { %v1947_v20 = vadd.f32 %v1946_v19, %v1945_v14 }
 0x1b1   : > { %1737 = vst [vmem:[%s2542_s25 + $0x58] sm:$0xff] %v1705_v16   ;;  %v1147_v21 = vadd.f32 %v1944_v13, %v986_v17  ;;  %v989_v22 = vadd.f32 %v1835_v18, %v2536_v34 }
 0x1b3   : > { %v1150_v23 = vadd.f32 %v1947_v20, %v989_v22  ;;  %v1836_v24 = vpop.f32.mrb[52].mxu0  ;;  %v1201_v27 = vmax.f32 %v1147_v21, 0.0 }
 0x1b4   : > { %v1948_v25 = vpop.f32.mrb[52].mxu1  ;;  %v1837_v26 = vpop.f32.mrb[53].mxu0 }
 0x1b5   : > { %v1202_v28 = vmax.f32 %v1150_v23, 0.0  ;;  %v1838_v29 = vadd.f32 %v1837_v26, %v1836_v24  ;;  %v1949_v30 = vpop.f32.mrb[53].mxu1  ;;  %v1839_v31 = vpop.f32.mrb[54].mxu0 }
 0x1b6   : > { %v1950_v32 = vadd.f32 %v1949_v30, %v1948_v25  ;;  %v1951_v33 = vpop.f32.mrb[54].mxu1  ;;  %v1840_v35 = vpop.f32.mrb[55].mxu0 }
 0x1b7   : > { %v1710_v36 = vpack.c.bf16 %v1202_v28, %v1201_v27  ;;  %v994_v37 = vadd.f32 %v1838_v29, %v2536_v34  ;;  %v1841_v38 = vadd.f32 %v1840_v35, %v1839_v31  ;;  %v1952_v39 = vpop.f32.mrb[55].mxu1 }
 0x1b8   : > { %v1953_v40 = vadd.f32 %v1952_v39, %v1951_v33 }
 0x1b9   : > { %1738 = vst [vmem:[%s2542_s25 + $0x60] sm:$0xff] %v1710_v36   ;;  %v1155_v41 = vadd.f32 %v1950_v32, %v994_v37  ;;  %v997_v42 = vadd.f32 %v1841_v38, %v2536_v34 }
 0x1bb   : > { %v1158_v43 = vadd.f32 %v1953_v40, %v997_v42  ;;  %v1842_v44 = vpop.f32.mrb[56].mxu0  ;;  %v1203_v47 = vmax.f32 %v1155_v41, 0.0 }
 0x1bc   : > { %v1954_v45 = vpop.f32.mrb[56].mxu1  ;;  %v1843_v46 = vpop.f32.mrb[57].mxu0 }
 0x1bd   : > { %v1204_v48 = vmax.f32 %v1158_v43, 0.0  ;;  %v1844_v49 = vadd.f32 %v1843_v46, %v1842_v44  ;;  %v1955_v50 = vpop.f32.mrb[57].mxu1  ;;  %v1845_v51 = vpop.f32.mrb[58].mxu0 }
 0x1be   : > { %v1956_v52 = vadd.f32 %v1955_v50, %v1954_v45  ;;  %v1957_v53 = vpop.f32.mrb[58].mxu1  ;;  %v1846_v54 = vpop.f32.mrb[59].mxu0 }
 0x1bf   : > { %v1715_v55 = vpack.c.bf16 %v1204_v48, %v1203_v47  ;;  %v1002_v56 = vadd.f32 %v1844_v49, %v2536_v34  ;;  %v1847_v57 = vadd.f32 %v1846_v54, %v1845_v51  ;;  %v1958_v58 = vpop.f32.mrb[59].mxu1 }
 0x1c0   : > { %v1959_v59 = vadd.f32 %v1958_v58, %v1957_v53 }
 0x1c1   : > { %1739 = vst [vmem:[%s2542_s25 + $0x68] sm:$0xff] %v1715_v55   ;;  %v1163_v60 = vadd.f32 %v1956_v52, %v1002_v56  ;;  %v1005_v61 = vadd.f32 %v1847_v57, %v2536_v34 }
 0x1c3   : > { %v1166_v62 = vadd.f32 %v1959_v59, %v1005_v61  ;;  %v1848_v63 = vpop.f32.mrb[60].mxu0  ;;  %v1205_v2 = vmax.f32 %v1163_v60, 0.0 }
 0x1c4   : > { %v1960_v0 = vpop.f32.mrb[60].mxu1  ;;  %v1849_v1 = vpop.f32.mrb[61].mxu0 }
 0x1c5   : > { %v1206_v3 = vmax.f32 %v1166_v62, 0.0  ;;  %v1850_v4 = vadd.f32 %v1849_v1, %v1848_v63  ;;  %v1961_v5 = vpop.f32.mrb[61].mxu1  ;;  %v1851_v6 = vpop.f32.mrb[62].mxu0 }
 0x1c6   : > { %v1962_v7 = vadd.f32 %v1961_v5, %v1960_v0  ;;  %v1963_v8 = vpop.f32.mrb[62].mxu1  ;;  %v1852_v9 = vpop.f32.mrb[63].mxu0 }
 0x1c7   : > { %v1720_v10 = vpack.c.bf16 %v1206_v3, %v1205_v2  ;;  %v1010_v11 = vadd.f32 %v1850_v4, %v2536_v34  ;;  %v1853_v12 = vadd.f32 %v1852_v9, %v1851_v6  ;;  %v1964_v13 = vpop.f32.mrb[63].mxu1 }
 0x1c8   : > { %v1965_v14 = vadd.f32 %v1964_v13, %v1963_v8 }
 0x1c9   : > { %1740 = vst [vmem:[%s2542_s25 + $0x70] sm:$0xff] %v1720_v10   ;;  %v1171_v15 = vadd.f32 %v1962_v7, %v1010_v11  ;;  %v1013_v16 = vadd.f32 %v1853_v12, %v2536_v34 }
 0x1cb   : > { %v1174_v17 = vadd.f32 %v1965_v14, %v1013_v16  ;;  %v1207_v18 = vmax.f32 %v1171_v15, 0.0 }
 0x1cd   : > { %v1208_v19 = vmax.f32 %v1174_v17, 0.0 }
 0x1cf   : > { %v1725_v20 = vpack.c.bf16 %v1208_v19, %v1207_v18 }
 0x1d1   : > { %1741 = vst [vmem:[%s2542_s25 + $0x78] sm:$0xff] %v1725_v20  }
 0x1d2   : > { %2228 = shalt.err (!%p2225_p7)
}
 0x1d3   : > { %s2229_s22 = scalar_lea.hbm %s2593_s27, 2048  ;;  %s2233_s9 = scalar_lea.hbm %s2643_s3, 4096 }
 0x1d4   : > { %p2230_p9 = scmp.ne.s32.totalorder %s2593_s27, %s2229_s22  ;;  %p2234_p5 = scmp.lt.u32.totalorder %s2593_s27, %s2643_s3 }
 0x1d5   : > { %p2235_p11 = scmp.lt.u32.totalorder %s2233_s9, %s2229_s22  ;;  %p2237_p4 = scmp.lt.u32.totalorder %s2229_s22, %s2593_s27 }
 0x1d6   : > { %p2231_p2 = pnand %p2230_p9, %p2407_p12 }
 0x1d7   : > { %p2236_p1 = por %p2235_p11, %p2234_p5 }
 0x1d8   : > { %p2232_p0 = pneg %p2231_p2 }
 0x1d9   : > { %p2238_p6 = por %p2237_p4, %p2236_p1 }
 0x1db   : > { %p2239_p8 = pnand %p2238_p6, %p2232_p0 }
 0x1dd   : > { %2242 = shalt.err (!%p2239_p8)
}
 0x1de   : > { %s2294_s4 = smov 64   ;;  %s2295_s25 = smov 4  }
 0x1df   : > { %1972 = dma.vmem_to_hbm [thread:$0]  (%p2407_p12), %s2595_s5, 2048, %s2593_s27, %s1370_s28, %s2294_s4, %s2294_s4, %s2295_s25  }
 0x1e0 PF: > { %s1398_s26 = sand.u32 1, %s2273_s12   ;;  %p2658_p10 = scmp.ne.s32.totalorder %s2648_s19, 0 }
 0x1e1   : > { %p2659_p13 = scmp.ge.s32.totalorder %s2285_s15, 2  ;;  %s1399_s10 = scalar_lea.sflag [#allocation4], %s1398_s26 }
 0x1e3   : > { %p1983_p3 = pnand %p2659_p13, %p2658_p10 }
 0x1e5   : > { %2268 = dma.done.wait (!%p1983_p3), %s1399_s10, 2048  }
 0x1e6   : > { %2270 = vsyncadd (!%p1983_p3), %s1399_s10, 4294965248  ;;  %p17_p7 = scmp.ge.s32.totalorder %s2372_s24, 4   ;;  %s2660_s12 = smov %s2277_s13 }
 0x1e7   : > { %s2661_s13 = smov %s2281_s14  ;;  %s2662_s14 = smov %s2403_s17 }
 0x1e8   : > { %s2663_s15 = smov %s2372_s24  ;;  %19 = sbr.rel (!%p17_p7) target bundleno = 6 (0x6), region = 81 }
 0x1ef   :  { %1404 = vsyncpa [#allocation3], 1 }
 0x1f0   :  { %1406 = vsyncpa [#allocation3 + $0x1], 1 }
 0x1f1   :  { %1407 = vsyncpa [#allocation6], 1 }
 0x1f2   :  { %1408 = vsyncpa [#allocation4], 1 }
 0x1f3   :  { %1410 = vsyncpa [#allocation4 + $0x1], 1 }

// kernel: tpu_custom_call.1
= control target key start
LH: loop header
LB: loop body
LE: loop exit
PB: predicated region body
PF: predicated region fallthrough
CT: control target
= control target key end

     0   :  { %8 = vsyncpa [#allocation3], 0  ;;  %s2640_s0 = inlined_call_operand.hbm [shape: bf16[512,512], index: 0, kind: input, shape index: {}]   ;;  %s2641_s1 = inlined_call_operand.hbm [shape: bf16[512,128], index: 1, kind: input, shape index: {}]   ;;  %s2642_s2 = inlined_call_operand.vmem [shape: f32[1,128], index: 2, kind: input, shape index: {}]   ;;  %s2643_s3 = inlined_call_operand.hbm [shape: bf16[512,128], index: 3, kind: output, shape index: {}]  }
   0x1   :  { %10 = vsyncpa [#allocation3 + $0x1], 0 }
   0x2   :  { %11 = vsyncpa [#allocation6], 0 }
   0x3   :  { %12 = vsyncpa [#allocation4], 0 }
   0x4   :  { %14 = vsyncpa [#allocation4 + $0x1], 0  ;;  %s2316_s12 = smov 0   ;;  %s2318_s13 = smov 0  }
   0x5   :  { %s2320_s14 = smov 0   ;;  %s2322_s15 = smov 0  }
   0x6 LB: > { %s2337_s16 = sadd.s32 4294967295, %s2285_s15   ;;  %s1466_s17 = sadd.s32 4294967294, %s2285_s15   ;;  %s2285_s15 = sphi %s2322_s15, %s2663_s15   ;;  %s2281_s14 = sphi %s2320_s14, %s2662_s14   ;;  %s2277_s13 = sphi %s2318_s13, %s2661_s13   ;;  %s2273_s12 = sphi %s2316_s12, %s2660_s12  }
   0x7   : > { %p40_p0 = scmp.ne.s32.totalorder %s2277_s13, %s2273_s12  ;;  %p2644_p1 = scmp.eq.s32.totalorder %s2337_s16, 0 }
   0x8   : > { %p112_p3 = scmp.eq.s32.totalorder %s1466_s17, 1  ;;  %p1467_p5 = scmp.ge.s32.totalorder %s2285_s15, 1 }
   0x9   : > { %p2346_p4 = por %p2644_p1, %p40_p0  ;;  %p119_p7 = scmp.lt.s32.totalorder %s2285_s15, 3 }
   0xa   : > { %p2351_p6 = por %p112_p3, %p40_p0  ;;  %s2287_s21 = smov [#allocation5]  }
   0xb   : > { %s2647_s18 = scalar_select %p2346_p4, 1, 0 }
   0xc   : > { %s2648_s19 = scalar_select %p2351_p6, 1, 0 }
   0xd   : > { %p2356_p8 = pnand %p1467_p5, %p119_p7  ;;  %s131_s22 = sshll.u32 %s2287_s21, 4  ;;  %s2360_s22 = int_to_ptr.vmem [resolvable:$true] %s131_s22 }
   0xe   : > { %s2372_s24 = sadd.s32 1, %s2285_s15   ;;  %s27_s25 = sadd.s32 1, %s2281_s14 }
   0xf   : > { %s2649_s20 = scalar_select %p2356_p8, 1, 0 }
  0x10   : > { %p1974_p9 = pneg %p2356_p8  ;;  %s24_s26 = ssub.s32 %s2285_s15, %s2372_s24 }
  0x11   : > { %s2157_s29 = scalar_lea.hbm %s2641_s1, 4096 }
  0x12   : > { %p2367_p11 = pnand %p1974_p9, %p2644_p1  ;;  %p2158_p12 = scmp.ne.s32.totalorder %s2641_s1, %s2157_s29 }
  0x13   : > { %p2164_p5 = scmp.lt.u32.totalorder %s2157_s29, %s2641_s1 }
  0x14   : > { %p2159_p13 = pneg %p2367_p11 }
  0x16   : > { %p2160_p0 = pnand %p2159_p13, %p2158_p12 }
  0x18   : > { %p2161_p3 = pneg %p2160_p0 }
  0x1a   : > { %p2166_p7 = pnand %p2164_p5, %p2161_p3 }
  0x1c   : > { %2169 = shalt.err (!%p2166_p7)
}
  0x1d   : > { %s2170_s7 = scalar_lea.vmem %s2360_s22, 4096  ;;  %p2178_p2 = scmp.lt.s32.totalorder %s2360_s22, %s2360_s22 }
  0x1e   : > { %p2171_p9 = scmp.ne.s32.totalorder %s2360_s22, %s2170_s7  ;;  %p2179_p6 = scmp.lt.s32.totalorder %s2170_s7, %s2170_s7 }
  0x20   : > { %p2173_p10 = pnand %p2171_p9, %p2159_p13  ;;  %p2180_p4 = por %p2179_p6, %p2178_p2 }
  0x22   : > { %p2174_p1 = pneg %p2173_p10 }
  0x24   : > { %p2181_p8 = pnand %p2180_p4, %p2174_p1 }
  0x26   : > { %2184 = shalt.err (!%p2181_p8)
}
  0x27   : > { %s2288_s8 = smov 64   ;;  %s2289_s9 = smov 4  }
  0x28   : > { %1977 = dma.hbm_to_vmem [thread:$0]  (!%p2367_p11), %s2641_s1, 4096, %s2360_s22, [#allocation6], %s2288_s8, %s2288_s8, %s2289_s9  }
  0x29   : > { %p25_p2 = scmp.eq.s32.totalorder %s24_s26, 0  ;;  %p34_p1 = scmp.ne.s32.totalorder %s2281_s14, %s2277_s13 }
  0x2a   : > { %p35_p4 = scmp.eq.s32.totalorder %s2285_s15, 0  ;;  %p1987_p6 = scmp.lt.s32.totalorder %s2285_s15, 2 }
  0x2b   : > { %s2403_s17 = scalar_select %p25_p2, %s2281_s14, %s27_s25  }
  0x2c   : > { %p36_p8 = por %p35_p4, %p34_p1  ;;  %p2651_p10 = scmp.eq.s32.totalorder %s2337_s16, 1 }
  0x2d   : > { %s148_s27 = sand.u32 1, %s2281_s14   ;;  %s1613_s28 = sshll.u32 %s2285_s15, 13 }
  0x2e   : > { %p2407_p12 = por %p2651_p10, %p34_p1  ;;  %s1470_s29 = sshll.u32 %s148_s27, 9 }
  0x2f   : > { %s2416_s4 = scalar_lea.hbm %s2640_s0, %s1613_s28  ;;  %s152_s22 = scalar_lea.vmem [#allocation2], %s1470_s29 }
  0x30   : > { %s160_s25 = sshll.u32 %s152_s22, 4  ;;  %p2418_p11 = pnand %p1987_p6, %p36_p8  ;;  %s2422_s25 = int_to_ptr.vmem [resolvable:$true] %s160_s25 }
  0x31   : > { %s2424_s5 = scalar_lea.sflag [#allocation3], %s148_s27  ;;  %s2185_s6 = scalar_lea.hbm %s2416_s4, 8192 }
  0x32   : > { %p2186_p13 = scmp.ne.s32.totalorder %s2416_s4, %s2185_s6  ;;  %p2187_p0 = pneg %p2418_p11 }
  0x33   : > { %s2190_s9 = scalar_lea.hbm %s2640_s0, 16384  ;;  %p2191_p7 = scmp.lt.u32.totalorder %s2416_s4, %s2640_s0 }
  0x34   : > { %p2188_p3 = pnand %p2187_p0, %p2186_p13  ;;  %p2192_p9 = scmp.lt.u32.totalorder %s2190_s9, %s2185_s6 }
  0x35   : > { %p2194_p1 = scmp.lt.u32.totalorder %s2185_s6, %s2416_s4 }
  0x36   : > { %p2189_p5 = pneg %p2188_p3  ;;  %p2193_p2 = por %p2192_p9, %p2191_p7 }
  0x38   : > { %p2195_p4 = por %p2194_p1, %p2193_p2 }
  0x3a   : > { %p2196_p6 = pnand %p2195_p4, %p2189_p5 }
  0x3c   : > { %2199 = shalt.err (!%p2196_p6)
}
  0x3d   : > { %s2200_s27 = scalar_lea.vmem %s2422_s25, 8192  ;;  %s2290_s28 = smov [#allocation2]  }
  0x3e   : > { %p2201_p8 = scmp.ne.s32.totalorder %s2422_s25, %s2200_s27  ;;  %s2205_s29 = sshll.u32 %s2290_s28, 4  ;;  %s2206_s29 = int_to_ptr.vmem [resolvable:$false] %s2205_s29 }
  0x3f   : > { %s2207_s23 = scalar_lea.vmem %s2206_s29, 16384  ;;  %p2208_p3 = scmp.lt.s32.totalorder %s2422_s25, %s2206_s29 }
  0x40   : > { %p2203_p10 = pnand %p2201_p8, %p2187_p0  ;;  %p2209_p7 = scmp.lt.s32.totalorder %s2207_s23, %s2200_s27 }
  0x42   : > { %p2204_p13 = pneg %p2203_p10  ;;  %p2210_p9 = por %p2209_p7, %p2208_p3 }
  0x44   : > { %p2211_p2 = pnand %p2210_p9, %p2204_p13 }
  0x46   : > { %2214 = shalt.err (!%p2211_p2)
}
  0x47   : > { %s2291_s30 = smov 256   ;;  %s2292_s22 = smov 16  }
  0x48   : > { %1981 = dma.hbm_to_vmem [thread:$0]  (!%p2418_p11), %s2416_s4, 8192, %s2422_s25, %s2424_s5, %s2291_s30, %s2291_s30, %s2292_s22  }
  0x49   : > { %p2654_p0 = scmp.ne.s32.totalorder %s2649_s20, 0 }
  0x4a   : > { %s2455_s6 = sand.u32 (!%p2654_p0), 1, %s2277_s13   ;;  %p2655_p5 = scmp.ne.s32.totalorder (!%p2654_p0), %s2647_s18, 0 }
  0x4b   : > { %172 = sbr.rel (%p2654_p0) target bundleno = 480 (0x1e0), region = 32  ;;  %s1475_s7 = sshll.u32 (!%p2654_p0), %s2455_s6, 9 }
  0x4c   : > { %s175_s8 = scalar_lea.sflag (!%p2654_p0), [#allocation3], %s2455_s6  ;;  %s2459_s9 = scalar_lea.vmem (!%p2654_p0), [#allocation2], %s1475_s7 }
  0x52   : > { %2260 = dma.done.wait (%p2655_p5), %s175_s8, 8192  }
  0x53   : > { %2262 = vsyncadd (%p2655_p5), %s175_s8, 4294959104  ;;  %p2656_p11 = scmp.eq.s32.totalorder %s2337_s16, 0 }
  0x55   : > { %2264 = dma.done.wait (%p2656_p11), [#allocation6], 4096   ;;  %p2657_p1 = pmov %p2656_p11 }
  0x56   : > { %v2029_v0 = vld [vmem:[#allocation5 + $0x40] sm:$0xff]   ;;  %v2033_v4 = vld [vmem:[#allocation5 + $0x48] sm:$0xff]   ;;  %v2037_v8 = vld [vmem:[#allocation5 + $0x50] sm:$0xff]   ;;  %s1477_s4 = sshll.u32 %s2455_s6, 7  ;;  %s1646_s26 = sshll.u32 %s2337_s16, 11 }
  0x57   : > { %2266 = vsyncadd (%p2657_p1), [#allocation6], 4294963200  ;;  %v2030_v1 = vld [vmem:[#allocation5 + $0xc0] sm:$0xff]   ;;  %1742 = vmatprep.subr.bf16.mxu0 %v2029_v0  ;;  %v2034_v5 = vld [vmem:[#allocation5 + $0xc8] sm:$0xff]   ;;  %s2542_s25 = scalar_lea.vmem [#allocation7], %s1477_s4  ;;  %s2593_s27 = scalar_lea.hbm %s2643_s3, %s1646_s26 }
  0x58   : > { %v2031_v2 = vld [vmem:[#allocation5] sm:$0xff]   ;;  %1854 = vmatprep.subr.bf16.mxu1 %v2030_v1  ;;  %v2035_v6 = vld [vmem:[#allocation5 + $0x8] sm:$0xff]   ;;  %v2038_v9 = vld [vmem:[#allocation5 + $0xd0] sm:$0xff]   ;;  %s1383_s5 = sshll.u32 %s2542_s25, 4  ;;  %s1370_s28 = scalar_lea.sflag [#allocation4], %s2455_s6  ;;  %s2595_s5 = int_to_ptr.vmem [resolvable:$true] %s1383_s5 }
  0x59   : > { %v2032_v3 = vld [vmem:[#allocation5 + $0x80] sm:$0xff]   ;;  %1743 = vmatpush3.bf16.msra.mxu0 %v2031_v2  ;;  %v2036_v7 = vld [vmem:[#allocation5 + $0x88] sm:$0xff]   ;;  %v2039_v10 = vld [vmem:[#allocation5 + $0x10] sm:$0xff]   ;;  %s2215_s29 = scalar_lea.vmem %s2595_s5, 2048  ;;  %s2293_s16 = smov [#allocation7]  }
  0x5a   : > { %1855 = vmatpush3.bf16.msra.mxu1 %v2032_v3  ;;  %1744 = vmatprep.subr.bf16.mxu0 %v2033_v4  ;;  %v2040_v11 = vld [vmem:[#allocation5 + $0x90] sm:$0xff]   ;;  %v2041_v12 = vld [vmem:[#allocation5 + $0x58] sm:$0xff]   ;;  %v2045_v16 = vld [vmem:[#allocation5 + $0x60] sm:$0xff]   ;;  %p2216_p4 = scmp.ne.s32.totalorder %s2595_s5, %s2215_s29  ;;  %s2219_s23 = sshll.u32 %s2293_s16, 4  ;;  %s2220_s23 = int_to_ptr.vmem [resolvable:$false] %s2219_s23 }
  0x5b   : > { %1856 = vmatprep.subr.bf16.mxu1 %v2034_v5  ;;  %v2042_v13 = vld [vmem:[#allocation5 + $0xd8] sm:$0xff]   ;;  %v2046_v17 = vld [vmem:[#allocation5 + $0xe0] sm:$0xff]   ;;  %v2049_v20 = vld [vmem:[#allocation5 + $0x68] sm:$0xff]   ;;  %s2221_s30 = scalar_lea.vmem %s2220_s23, 4096  ;;  %p2222_p10 = scmp.lt.s32.totalorder %s2595_s5, %s2220_s23 }
  0x5c   : > { %v2043_v14 = vld [vmem:[#allocation5 + $0x18] sm:$0xff]   ;;  %v2047_v18 = vld [vmem:[#allocation5 + $0x20] sm:$0xff]   ;;  %v2050_v21 = vld [vmem:[#allocation5 + $0xe8] sm:$0xff]   ;;  %p2217_p6 = pnand %p2216_p4, %p2407_p12  ;;  %p2223_p13 = scmp.lt.s32.totalorder %s2221_s30, %s2215_s29 }
  0x5d   : > { %1745 = vmatpush3.bf16.msra.mxu0 %v2035_v6  ;;  %v2044_v15 = vld [vmem:[#allocation5 + $0x98] sm:$0xff]   ;;  %v2048_v19 = vld [vmem:[#allocation5 + $0xa0] sm:$0xff]   ;;  %v2051_v22 = vld [vmem:[#allocation5 + $0x28] sm:$0xff]  }
  0x5e   : > { %1857 = vmatpush3.bf16.msra.mxu1 %v2036_v7  ;;  %1746 = vmatprep.subr.bf16.mxu0 %v2037_v8  ;;  %v2052_v23 = vld [vmem:[#allocation5 + $0xa8] sm:$0xff]   ;;  %v2053_v24 = vld [vmem:[#allocation5 + $0x70] sm:$0xff]   ;;  %v2057_v28 = vld [vmem:[#allocation5 + $0x78] sm:$0xff]   ;;  %p2218_p8 = pneg %p2217_p6  ;;  %p2224_p3 = por %p2223_p13, %p2222_p10 }
  0x5f   : > { %1858 = vmatprep.subr.bf16.mxu1 %v2038_v9  ;;  %v2054_v25 = vld [vmem:[#allocation5 + $0xf0] sm:$0xff]   ;;  %v2058_v29 = vld [vmem:[#allocation5 + $0xf8] sm:$0xff]  }
  0x60   : > { %v2055_v26 = vld [vmem:[#allocation5 + $0x30] sm:$0xff]   ;;  %v2059_v30 = vld [vmem:[#allocation5 + $0x38] sm:$0xff]   ;;  %p2225_p7 = pnand %p2224_p3, %p2218_p8 }
  0x61   : > { %1747 = vmatpush3.bf16.msra.mxu0 %v2039_v10  ;;  %v2056_v27 = vld [vmem:[#allocation5 + $0xb0] sm:$0xff]   ;;  %v2060_v31 = vld [vmem:[#allocation5 + $0xb8] sm:$0xff]  }
  0x62   : > { %1859 = vmatpush3.bf16.msra.mxu1 %v2040_v11  ;;  %1748 = vmatprep.subr.bf16.mxu0 %v2041_v12  ;;  %v2061_v32 = vld [vmem:[%s2459_s9] ss:$16 sps:$4 sm:$0xff]   ;;  %v2063_v33 = vld [vmem:[%s2459_s9 + $0x4] ss:$16 sps:$4 sm:$0xff]   ;;  %v2064_v34 = vld [vmem:[%s2459_s9 + $0x8] ss:$16 sps:$4 sm:$0xff]  }
  0x63   : > { %1860 = vmatprep.subr.bf16.mxu1 %v2042_v13  ;;  %v2066_v35 = vld [vmem:[%s2459_s9 + $0xc] ss:$16 sps:$4 sm:$0xff]   ;;  %887 = vmatprep.mubr.bf16.mxu0 %v2063_v33  ;;  %v2067_v36 = vld [vmem:[%s2459_s9 + $0x24] ss:$16 sps:$4 sm:$0xff]   ;;  %v2071_v38 = vld [vmem:[%s2459_s9 + $0x20] ss:$16 sps:$4 sm:$0xff]  }
  0x64   : > { %1048 = vmatprep.mubr.bf16.mxu1 %v2066_v35  ;;  %v2069_v37 = vld [vmem:[%s2459_s9 + $0x2c] ss:$16 sps:$4 sm:$0xff]   ;;  %v2072_v39 = vld [vmem:[%s2459_s9 + $0x28] ss:$16 sps:$4 sm:$0xff]   ;;  %v2073_v40 = vld [vmem:[%s2459_s9 + $0x44] ss:$16 sps:$4 sm:$0xff]  }
  0x65   : > { %1749 = vmatpush3.bf16.msra.mxu0 %v2043_v14  ;;  %v2075_v41 = vld [vmem:[%s2459_s9 + $0x4c] ss:$16 sps:$4 sm:$0xff]   ;;  %v2077_v42 = vld [vmem:[%s2459_s9 + $0x40] ss:$16 sps:$4 sm:$0xff]   ;;  %v2078_v43 = vld [vmem:[%s2459_s9 + $0x48] ss:$16 sps:$4 sm:$0xff]  }
  0x66   : > { %1861 = vmatpush3.bf16.msra.mxu1 %v2044_v15  ;;  %1750 = vmatprep.subr.bf16.mxu0 %v2045_v16  ;;  %v2079_v44 = vld [vmem:[%s2459_s9 + $0x64] ss:$16 sps:$4 sm:$0xff]   ;;  %v2081_v45 = vld [vmem:[%s2459_s9 + $0x6c] ss:$16 sps:$4 sm:$0xff]   ;;  %v2083_v46 = vld [vmem:[%s2459_s9 + $0x60] ss:$16 sps:$4 sm:$0xff]  }
  0x67   : > { %1862 = vmatprep.subr.bf16.mxu1 %v2046_v17  ;;  %v2084_v47 = vld [vmem:[%s2459_s9 + $0x68] ss:$16 sps:$4 sm:$0xff]   ;;  %v2085_v48 = vld [vmem:[%s2459_s9 + $0x84] ss:$16 sps:$4 sm:$0xff]   ;;  %v2087_v49 = vld [vmem:[%s2459_s9 + $0x8c] ss:$16 sps:$4 sm:$0xff]  }
  0x68   : > { %v2089_v50 = vld [vmem:[%s2459_s9 + $0x80] ss:$16 sps:$4 sm:$0xff]   ;;  %v2090_v51 = vld [vmem:[%s2459_s9 + $0x88] ss:$16 sps:$4 sm:$0xff]   ;;  %v2091_v52 = vld [vmem:[%s2459_s9 + $0xa4] ss:$16 sps:$4 sm:$0xff]  }
  0x69   : > { %1751 = vmatpush3.bf16.msra.mxu0 %v2047_v18  ;;  %v2093_v53 = vld [vmem:[%s2459_s9 + $0xac] ss:$16 sps:$4 sm:$0xff]   ;;  %v2095_v54 = vld [vmem:[%s2459_s9 + $0xa0] ss:$16 sps:$4 sm:$0xff]   ;;  %v2096_v55 = vld [vmem:[%s2459_s9 + $0xa8] ss:$16 sps:$4 sm:$0xff]  }
  0x6a   : > { %1863 = vmatpush3.bf16.msra.mxu1 %v2048_v19  ;;  %1752 = vmatprep.subr.bf16.mxu0 %v2049_v20  ;;  %v2097_v56 = vld [vmem:[%s2459_s9 + $0xc4] ss:$16 sps:$4 sm:$0xff]   ;;  %v2099_v57 = vld [vmem:[%s2459_s9 + $0xcc] ss:$16 sps:$4 sm:$0xff]   ;;  %v2101_v58 = vld [vmem:[%s2459_s9 + $0xc0] ss:$16 sps:$4 sm:$0xff]  }
  0x6b   : > { %1864 = vmatprep.subr.bf16.mxu1 %v2050_v21  ;;  %v2102_v59 = vld [vmem:[%s2459_s9 + $0xc8] ss:$16 sps:$4 sm:$0xff]   ;;  %v2103_v60 = vld [vmem:[%s2459_s9 + $0xe4] ss:$16 sps:$4 sm:$0xff]   ;;  %v2105_v61 = vld [vmem:[%s2459_s9 + $0xec] ss:$16 sps:$4 sm:$0xff]  }
  0x6c   : > { %v2107_v62 = vld [vmem:[%s2459_s9 + $0xe0] ss:$16 sps:$4 sm:$0xff]   ;;  %v2108_v63 = vld [vmem:[%s2459_s9 + $0xe8] ss:$16 sps:$4 sm:$0xff]   ;;  %v2109_v0 = vld [vmem:[%s2459_s9 + $0x104] ss:$16 sps:$4 sm:$0xff]  }
  0x6d   : > { %1753 = vmatpush3.bf16.msra.mxu0 %v2051_v22  ;;  %v2111_v1 = vld [vmem:[%s2459_s9 + $0x10c] ss:$16 sps:$4 sm:$0xff]   ;;  %v2113_v2 = vld [vmem:[%s2459_s9 + $0x100] ss:$16 sps:$4 sm:$0xff]   ;;  %v2114_v3 = vld [vmem:[%s2459_s9 + $0x108] ss:$16 sps:$4 sm:$0xff]  }
  0x6e   : > { %1865 = vmatpush3.bf16.msra.mxu1 %v2052_v23  ;;  %1754 = vmatprep.subr.bf16.mxu0 %v2053_v24  ;;  %v2115_v4 = vld [vmem:[%s2459_s9 + $0x124] ss:$16 sps:$4 sm:$0xff]   ;;  %v2117_v5 = vld [vmem:[%s2459_s9 + $0x12c] ss:$16 sps:$4 sm:$0xff]   ;;  %v2119_v6 = vld [vmem:[%s2459_s9 + $0x120] ss:$16 sps:$4 sm:$0xff]  }
  0x6f   : > { %1866 = vmatprep.subr.bf16.mxu1 %v2054_v25  ;;  %v2120_v7 = vld [vmem:[%s2459_s9 + $0x128] ss:$16 sps:$4 sm:$0xff]   ;;  %v2121_v8 = vld [vmem:[%s2459_s9 + $0x144] ss:$16 sps:$4 sm:$0xff]   ;;  %v2123_v9 = vld [vmem:[%s2459_s9 + $0x14c] ss:$16 sps:$4 sm:$0xff]  }
  0x70   : > { %v2125_v10 = vld [vmem:[%s2459_s9 + $0x140] ss:$16 sps:$4 sm:$0xff]   ;;  %v2126_v11 = vld [vmem:[%s2459_s9 + $0x148] ss:$16 sps:$4 sm:$0xff]   ;;  %v2127_v12 = vld [vmem:[%s2459_s9 + $0x164] ss:$16 sps:$4 sm:$0xff]  }
  0x71   : > { %1755 = vmatpush3.bf16.msra.mxu0 %v2055_v26  ;;  %v2129_v13 = vld [vmem:[%s2459_s9 + $0x16c] ss:$16 sps:$4 sm:$0xff]   ;;  %v2131_v14 = vld [vmem:[%s2459_s9 + $0x160] ss:$16 sps:$4 sm:$0xff]   ;;  %v2132_v15 = vld [vmem:[%s2459_s9 + $0x168] ss:$16 sps:$4 sm:$0xff]  }
  0x72   : > { %1867 = vmatpush3.bf16.msra.mxu1 %v2056_v27  ;;  %1756 = vmatprep.subr.bf16.mxu0 %v2057_v28  ;;  %v2133_v16 = vld [vmem:[%s2459_s9 + $0x184] ss:$16 sps:$4 sm:$0xff]   ;;  %v2135_v17 = vld [vmem:[%s2459_s9 + $0x18c] ss:$16 sps:$4 sm:$0xff]   ;;  %v2137_v18 = vld [vmem:[%s2459_s9 + $0x180] ss:$16 sps:$4 sm:$0xff]  }
  0x73   : > { %1868 = vmatprep.subr.bf16.mxu1 %v2058_v29  ;;  %v2138_v19 = vld [vmem:[%s2459_s9 + $0x188] ss:$16 sps:$4 sm:$0xff]   ;;  %v2139_v20 = vld [vmem:[%s2459_s9 + $0x1a4] ss:$16 sps:$4 sm:$0xff]   ;;  %v2141_v21 = vld [vmem:[%s2459_s9 + $0x1ac] ss:$16 sps:$4 sm:$0xff]  }
  0x74   : > { %v2143_v22 = vld [vmem:[%s2459_s9 + $0x1a0] ss:$16 sps:$4 sm:$0xff]   ;;  %v2144_v23 = vld [vmem:[%s2459_s9 + $0x1a8] ss:$16 sps:$4 sm:$0xff]   ;;  %v2145_v24 = vld [vmem:[%s2459_s9 + $0x1c4] ss:$16 sps:$4 sm:$0xff]  }
  0x75   : > { %1757 = vmatpush3.bf16.msra.mxu0 %v2059_v30  ;;  %v2147_v25 = vld [vmem:[%s2459_s9 + $0x1cc] ss:$16 sps:$4 sm:$0xff]   ;;  %v2149_v26 = vld [vmem:[%s2459_s9 + $0x1c0] ss:$16 sps:$4 sm:$0xff]   ;;  %v2150_v27 = vld [vmem:[%s2459_s9 + $0x1c8] ss:$16 sps:$4 sm:$0xff]  }
  0x76   : > { %1869 = vmatpush3.bf16.msra.mxu1 %v2060_v31  ;;  %v2151_v28 = vld [vmem:[%s2459_s9 + $0x1e4] ss:$16 sps:$4 sm:$0xff]   ;;  %v2153_v29 = vld [vmem:[%s2459_s9 + $0x1ec] ss:$16 sps:$4 sm:$0xff]   ;;  %v2155_v30 = vld [vmem:[%s2459_s9 + $0x1e0] ss:$16 sps:$4 sm:$0xff]  }
  0x77   : > { %v2156_v31 = vld [vmem:[%s2459_s9 + $0x1e8] ss:$16 sps:$4 sm:$0xff]  }
  0x78   : > { %888 = vmatmul.mubr.bf16.vlgmr.msra.gmra.mrb[0].mxu0 %v2061_v32 }
  0x79   : > { %1049 = vmatmul.mubr.bf16.vlgmr.msra.gmra.mrb[0].mxu1 %v2064_v34  ;;  %895 = vmatprep.mubr.bf16.mxu0 %v2067_v36  ;;  %v2536_v34 = vld [vmem:[%s2642_s2] ss:$0 sm:$0xff] }
  0x7a   : > { %1056 = vmatprep.mubr.bf16.mxu1 %v2069_v37 }
  0x80   : > { %896 = vmatmul.mubr.bf16.gmra.mrb[4].mxu0 %v2071_v38 }
  0x81   : > { %1057 = vmatmul.mubr.bf16.gmra.mrb[4].mxu1 %v2072_v39  ;;  %903 = vmatprep.mubr.bf16.mxu0 %v2073_v40 }
  0x82   : > { %1064 = vmatprep.mubr.bf16.mxu1 %v2075_v41 }
  0x88   : > { %904 = vmatmul.mubr.bf16.gmra.mrb[8].mxu0 %v2077_v42 }
  0x89   : > { %1065 = vmatmul.mubr.bf16.gmra.mrb[8].mxu1 %v2078_v43  ;;  %911 = vmatprep.mubr.bf16.mxu0 %v2079_v44 }
  0x8a   : > { %1072 = vmatprep.mubr.bf16.mxu1 %v2081_v45 }
  0x90   : > { %912 = vmatmul.mubr.bf16.gmra.mrb[12].mxu0 %v2083_v46 }
  0x91   : > { %1073 = vmatmul.mubr.bf16.gmra.mrb[12].mxu1 %v2084_v47  ;;  %919 = vmatprep.mubr.bf16.mxu0 %v2085_v48 }
  0x92   : > { %1080 = vmatprep.mubr.bf16.mxu1 %v2087_v49 }
  0x98   : > { %920 = vmatmul.mubr.bf16.gmra.mrb[16].mxu0 %v2089_v50 }
  0x99   : > { %1081 = vmatmul.mubr.bf16.gmra.mrb[16].mxu1 %v2090_v51  ;;  %927 = vmatprep.mubr.bf16.mxu0 %v2091_v52 }
  0x9a   : > { %1088 = vmatprep.mubr.bf16.mxu1 %v2093_v53 }
  0xa0   : > { %928 = vmatmul.mubr.bf16.gmra.mrb[20].mxu0 %v2095_v54 }
  0xa1   : > { %1089 = vmatmul.mubr.bf16.gmra.mrb[20].mxu1 %v2096_v55  ;;  %935 = vmatprep.mubr.bf16.mxu0 %v2097_v56 }
  0xa2   : > { %1096 = vmatprep.mubr.bf16.mxu1 %v2099_v57 }
  0xa8   : > { %936 = vmatmul.mubr.bf16.gmra.mrb[24].mxu0 %v2101_v58 }
  0xa9   : > { %1097 = vmatmul.mubr.bf16.gmra.mrb[24].mxu1 %v2102_v59  ;;  %943 = vmatprep.mubr.bf16.mxu0 %v2103_v60 }
  0xaa   : > { %1104 = vmatprep.mubr.bf16.mxu1 %v2105_v61 }
  0xb0   : > { %944 = vmatmul.mubr.bf16.gmra.mrb[28].mxu0 %v2107_v62 }
  0xb1   : > { %1105 = vmatmul.mubr.bf16.gmra.mrb[28].mxu1 %v2108_v63  ;;  %951 = vmatprep.mubr.bf16.mxu0 %v2109_v0 }
  0xb2   : > { %1112 = vmatprep.mubr.bf16.mxu1 %v2111_v1 }
  0xb8   : > { %952 = vmatmul.mubr.bf16.gmra.mrb[32].mxu0 %v2113_v2 }
  0xb9   : > { %1113 = vmatmul.mubr.bf16.gmra.mrb[32].mxu1 %v2114_v3  ;;  %959 = vmatprep.mubr.bf16.mxu0 %v2115_v4 }
  0xba   : > { %1120 = vmatprep.mubr.bf16.mxu1 %v2117_v5 }
  0xc0   : > { %960 = vmatmul.mubr.bf16.gmra.mrb[36].mxu0 %v2119_v6 }
  0xc1   : > { %1121 = vmatmul.mubr.bf16.gmra.mrb[36].mxu1 %v2120_v7  ;;  %967 = vmatprep.mubr.bf16.mxu0 %v2121_v8 }
  0xc2   : > { %1128 = vmatprep.mubr.bf16.mxu1 %v2123_v9 }
  0xc8   : > { %968 = vmatmul.mubr.bf16.gmra.mrb[40].mxu0 %v2125_v10 }
  0xc9   : > { %1129 = vmatmul.mubr.bf16.gmra.mrb[40].mxu1 %v2126_v11  ;;  %975 = vmatprep.mubr.bf16.mxu0 %v2127_v12 }
  0xca   : > { %1136 = vmatprep.mubr.bf16.mxu1 %v2129_v13 }
  0xd0   : > { %976 = vmatmul.mubr.bf16.gmra.mrb[44].mxu0 %v2131_v14 }
  0xd1   : > { %1137 = vmatmul.mubr.bf16.gmra.mrb[44].mxu1 %v2132_v15  ;;  %983 = vmatprep.mubr.bf16.mxu0 %v2133_v16 }
  0xd2   : > { %1144 = vmatprep.mubr.bf16.mxu1 %v2135_v17 }
  0xd8   : > { %984 = vmatmul.mubr.bf16.gmra.mrb[48].mxu0 %v2137_v18 }
  0xd9   : > { %1145 = vmatmul.mubr.bf16.gmra.mrb[48].mxu1 %v2138_v19  ;;  %991 = vmatprep.mubr.bf16.mxu0 %v2139_v20 }
  0xda   : > { %1152 = vmatprep.mubr.bf16.mxu1 %v2141_v21 }
  0xe0   : > { %992 = vmatmul.mubr.bf16.gmra.mrb[52].mxu0 %v2143_v22 }
  0xe1   : > { %1153 = vmatmul.mubr.bf16.gmra.mrb[52].mxu1 %v2144_v23  ;;  %999 = vmatprep.mubr.bf16.mxu0 %v2145_v24 }
  0xe2   : > { %1160 = vmatprep.mubr.bf16.mxu1 %v2147_v25 }
  0xe8   : > { %1000 = vmatmul.mubr.bf16.gmra.mrb[56].mxu0 %v2149_v26 }
  0xe9   : > { %1161 = vmatmul.mubr.bf16.gmra.mrb[56].mxu1 %v2150_v27  ;;  %1007 = vmatprep.mubr.bf16.mxu0 %v2151_v28 }
  0xea   : > { %1168 = vmatprep.mubr.bf16.mxu1 %v2153_v29 }
  0xf0   : > { %1008 = vmatmul.mubr.bf16.gmra.mrb[60].mxu0 %v2155_v30 }
  0xf1   : > { %1169 = vmatmul.mubr.bf16.gmra.mrb[60].mxu1 %v2156_v31 }
 0x14b   : > { %v1758_v32 = vpop.f32.mrb[0].mxu0 }
 0x14c   : > { %v1870_v33 = vpop.f32.mrb[0].mxu1  ;;  %v1759_v35 = vpop.f32.mrb[1].mxu0 }
 0x14d   : > { %v1760_v36 = vadd.f32 %v1759_v35, %v1758_v32  ;;  %v1871_v37 = vpop.f32.mrb[1].mxu1  ;;  %v1761_v38 = vpop.f32.mrb[2].mxu0 }
 0x14e   : > { %v1872_v39 = vadd.f32 %v1871_v37, %v1870_v33  ;;  %v1873_v40 = vpop.f32.mrb[2].mxu1  ;;  %v1762_v41 = vpop.f32.mrb[3].mxu0 }
 0x14f   : > { %v890_v42 = vadd.f32 %v1760_v36, %v2536_v34  ;;  %v1763_v43 = vadd.f32 %v1762_v41, %v1761_v38  ;;  %v1874_v44 = vpop.f32.mrb[3].mxu1 }
 0x150   : > { %v1875_v45 = vadd.f32 %v1874_v44, %v1873_v40 }
 0x151   : > { %v1051_v46 = vadd.f32 %v1872_v39, %v890_v42  ;;  %v893_v47 = vadd.f32 %v1763_v43, %v2536_v34 }
 0x153   : > { %v1054_v48 = vadd.f32 %v1875_v45, %v893_v47  ;;  %v1764_v49 = vpop.f32.mrb[4].mxu0  ;;  %v1177_v52 = vmax.f32 %v1051_v46, 0.0 }
 0x154   : > { %v1876_v50 = vpop.f32.mrb[4].mxu1  ;;  %v1765_v51 = vpop.f32.mrb[5].mxu0 }
 0x155   : > { %v1178_v53 = vmax.f32 %v1054_v48, 0.0  ;;  %v1766_v54 = vadd.f32 %v1765_v51, %v1764_v49  ;;  %v1877_v55 = vpop.f32.mrb[5].mxu1  ;;  %v1767_v56 = vpop.f32.mrb[6].mxu0 }
 0x156   : > { %v1878_v57 = vadd.f32 %v1877_v55, %v1876_v50  ;;  %v1879_v58 = vpop.f32.mrb[6].mxu1  ;;  %v1768_v59 = vpop.f32.mrb[7].mxu0 }
 0x157   : > { %v1650_v60 = vpack.c.bf16 %v1178_v53, %v1177_v52  ;;  %v898_v61 = vadd.f32 %v1766_v54, %v2536_v34  ;;  %v1769_v62 = vadd.f32 %v1768_v59, %v1767_v56  ;;  %v1880_v63 = vpop.f32.mrb[7].mxu1 }
 0x158   : > { %v1881_v0 = vadd.f32 %v1880_v63, %v1879_v58 }
 0x159   : > { %1651 = vst [vmem:[%s2542_s25] sm:$0xff] %v1650_v60   ;;  %v1059_v1 = vadd.f32 %v1878_v57, %v898_v61  ;;  %v901_v2 = vadd.f32 %v1769_v62, %v2536_v34 }
 0x15b   : > { %v1062_v3 = vadd.f32 %v1881_v0, %v901_v2  ;;  %v1770_v4 = vpop.f32.mrb[8].mxu0  ;;  %v1179_v7 = vmax.f32 %v1059_v1, 0.0 }
 0x15c   : > { %v1882_v5 = vpop.f32.mrb[8].mxu1  ;;  %v1771_v6 = vpop.f32.mrb[9].mxu0 }
 0x15d   : > { %v1180_v8 = vmax.f32 %v1062_v3, 0.0  ;;  %v1772_v9 = vadd.f32 %v1771_v6, %v1770_v4  ;;  %v1883_v10 = vpop.f32.mrb[9].mxu1  ;;  %v1773_v11 = vpop.f32.mrb[10].mxu0 }
 0x15e   : > { %v1884_v12 = vadd.f32 %v1883_v10, %v1882_v5  ;;  %v1885_v13 = vpop.f32.mrb[10].mxu1  ;;  %v1774_v14 = vpop.f32.mrb[11].mxu0 }
 0x15f   : > { %v1655_v15 = vpack.c.bf16 %v1180_v8, %v1179_v7  ;;  %v906_v16 = vadd.f32 %v1772_v9, %v2536_v34  ;;  %v1775_v17 = vadd.f32 %v1774_v14, %v1773_v11  ;;  %v1886_v18 = vpop.f32.mrb[11].mxu1 }
 0x160   : > { %v1887_v19 = vadd.f32 %v1886_v18, %v1885_v13 }
 0x161   : > { %1727 = vst [vmem:[%s2542_s25 + $0x8] sm:$0xff] %v1655_v15   ;;  %v1067_v20 = vadd.f32 %v1884_v12, %v906_v16  ;;  %v909_v21 = vadd.f32 %v1775_v17, %v2536_v34 }
 0x163   : > { %v1070_v22 = vadd.f32 %v1887_v19, %v909_v21  ;;  %v1776_v23 = vpop.f32.mrb[12].mxu0  ;;  %v1181_v26 = vmax.f32 %v1067_v20, 0.0 }
 0x164   : > { %v1888_v24 = vpop.f32.mrb[12].mxu1  ;;  %v1777_v25 = vpop.f32.mrb[13].mxu0 }
 0x165   : > { %v1182_v27 = vmax.f32 %v1070_v22, 0.0  ;;  %v1778_v28 = vadd.f32 %v1777_v25, %v1776_v23  ;;  %v1889_v29 = vpop.f32.mrb[13].mxu1  ;;  %v1779_v30 = vpop.f32.mrb[14].mxu0 }
 0x166   : > { %v1890_v31 = vadd.f32 %v1889_v29, %v1888_v24  ;;  %v1891_v32 = vpop.f32.mrb[14].mxu1  ;;  %v1780_v33 = vpop.f32.mrb[15].mxu0 }
 0x167   : > { %v1660_v35 = vpack.c.bf16 %v1182_v27, %v1181_v26  ;;  %v914_v36 = vadd.f32 %v1778_v28, %v2536_v34  ;;  %v1781_v37 = vadd.f32 %v1780_v33, %v1779_v30  ;;  %v1892_v38 = vpop.f32.mrb[15].mxu1 }
 0x168   : > { %v1893_v39 = vadd.f32 %v1892_v38, %v1891_v32 }
 0x169   : > { %1728 = vst [vmem:[%s2542_s25 + $0x10] sm:$0xff] %v1660_v35   ;;  %v1075_v40 = vadd.f32 %v1890_v31, %v914_v36  ;;  %v917_v41 = vadd.f32 %v1781_v37, %v2536_v34 }
 0x16b   : > { %v1078_v42 = vadd.f32 %v1893_v39, %v917_v41  ;;  %v1782_v43 = vpop.f32.mrb[16].mxu0  ;;  %v1183_v46 = vmax.f32 %v1075_v40, 0.0 }
 0x16c   : > { %v1894_v44 = vpop.f32.mrb[16].mxu1  ;;  %v1783_v45 = vpop.f32.mrb[17].mxu0 }
 0x16d   : > { %v1184_v47 = vmax.f32 %v1078_v42, 0.0  ;;  %v1784_v48 = vadd.f32 %v1783_v45, %v1782_v43  ;;  %v1895_v49 = vpop.f32.mrb[17].mxu1  ;;  %v1785_v50 = vpop.f32.mrb[18].mxu0 }
 0x16e   : > { %v1896_v51 = vadd.f32 %v1895_v49, %v1894_v44  ;;  %v1897_v52 = vpop.f32.mrb[18].mxu1  ;;  %v1786_v53 = vpop.f32.mrb[19].mxu0 }
 0x16f   : > { %v1665_v54 = vpack.c.bf16 %v1184_v47, %v1183_v46  ;;  %v922_v55 = vadd.f32 %v1784_v48, %v2536_v34  ;;  %v1787_v56 = vadd.f32 %v1786_v53, %v1785_v50  ;;  %v1898_v57 = vpop.f32.mrb[19].mxu1 }
 0x170   : > { %v1899_v58 = vadd.f32 %v1898_v57, %v1897_v52 }
 0x171   : > { %1729 = vst [vmem:[%s2542_s25 + $0x18] sm:$0xff] %v1665_v54   ;;  %v1083_v59 = vadd.f32 %v1896_v51, %v922_v55  ;;  %v925_v60 = vadd.f32 %v1787_v56, %v2536_v34 }
 0x173   : > { %v1086_v61 = vadd.f32 %v1899_v58, %v925_v60  ;;  %v1788_v62 = vpop.f32.mrb[20].mxu0  ;;  %v1185_v1 = vmax.f32 %v1083_v59, 0.0 }
 0x174   : > { %v1900_v63 = vpop.f32.mrb[20].mxu1  ;;  %v1789_v0 = vpop.f32.mrb[21].mxu0 }
 0x175   : > { %v1186_v2 = vmax.f32 %v1086_v61, 0.0  ;;  %v1790_v3 = vadd.f32 %v1789_v0, %v1788_v62  ;;  %v1901_v4 = vpop.f32.mrb[21].mxu1  ;;  %v1791_v5 = vpop.f32.mrb[22].mxu0 }
 0x176   : > { %v1902_v6 = vadd.f32 %v1901_v4, %v1900_v63  ;;  %v1903_v7 = vpop.f32.mrb[22].mxu1  ;;  %v1792_v8 = vpop.f32.mrb[23].mxu0 }
 0x177   : > { %v1670_v9 = vpack.c.bf16 %v1186_v2, %v1185_v1  ;;  %v930_v10 = vadd.f32 %v1790_v3, %v2536_v34  ;;  %v1793_v11 = vadd.f32 %v1792_v8, %v1791_v5  ;;  %v1904_v12 = vpop.f32.mrb[23].mxu1 }
 0x178   : > { %v1905_v13 = vadd.f32 %v1904_v12, %v1903_v7 }
 0x179   : > { %1730 = vst [vmem:[%s2542_s25 + $0x20] sm:$0xff] %v1670_v9   ;;  %v1091_v14 = vadd.f32 %v1902_v6, %v930_v10  ;;  %v933_v15 = vadd.f32 %v1793_v11, %v2536_v34 }
 0x17b   : > { %v1094_v16 = vadd.f32 %v1905_v13, %v933_v15  ;;  %v1794_v17 = vpop.f32.mrb[24].mxu0  ;;  %v1187_v20 = vmax.f32 %v1091_v14, 0.0 }
 0x17c   : > { %v1906_v18 = vpop.f32.mrb[24].mxu1  ;;  %v1795_v19 = vpop.f32.mrb[25].mxu0 }
 0x17d   : > { %v1188_v21 = vmax.f32 %v1094_v16, 0.0  ;;  %v1796_v22 = vadd.f32 %v1795_v19, %v1794_v17  ;;  %v1907_v23 = vpop.f32.mrb[25].mxu1  ;;  %v1797_v24 = vpop.f32.mrb[26].mxu0 }
 0x17e   : > { %v1908_v25 = vadd.f32 %v1907_v23, %v1906_v18  ;;  %v1909_v26 = vpop.f32.mrb[26].mxu1  ;;  %v1798_v27 = vpop.f32.mrb[27].mxu0 }
 0x17f   : > { %v1675_v28 = vpack.c.bf16 %v1188_v21, %v1187_v20  ;;  %v938_v29 = vadd.f32 %v1796_v22, %v2536_v34  ;;  %v1799_v30 = vadd.f32 %v1798_v27, %v1797_v24  ;;  %v1910_v31 = vpop.f32.mrb[27].mxu1 }
 0x180   : > { %v1911_v32 = vadd.f32 %v1910_v31, %v1909_v26 }
 0x181   : > { %1731 = vst [vmem:[%s2542_s25 + $0x28] sm:$0xff] %v1675_v28   ;;  %v1099_v33 = vadd.f32 %v1908_v25, %v938_v29  ;;  %v941_v35 = vadd.f32 %v1799_v30, %v2536_v34 }
 0x183   : > { %v1102_v36 = vadd.f32 %v1911_v32, %v941_v35  ;;  %v1800_v37 = vpop.f32.mrb[28].mxu0  ;;  %v1189_v40 = vmax.f32 %v1099_v33, 0.0 }
 0x184   : > { %v1912_v38 = vpop.f32.mrb[28].mxu1  ;;  %v1801_v39 = vpop.f32.mrb[29].mxu0 }
 0x185   : > { %v1190_v41 = vmax.f32 %v1102_v36, 0.0  ;;  %v1802_v42 = vadd.f32 %v1801_v39, %v1800_v37  ;;  %v1913_v43 = vpop.f32.mrb[29].mxu1  ;;  %v1803_v44 = vpop.f32.mrb[30].mxu0 }
 0x186   : > { %v1914_v45 = vadd.f32 %v1913_v43, %v1912_v38  ;;  %v1915_v46 = vpop.f32.mrb[30].mxu1  ;;  %v1804_v47 = vpop.f32.mrb[31].mxu0 }
 0x187   : > { %v1680_v48 = vpack.c.bf16 %v1190_v41, %v1189_v40  ;;  %v946_v49 = vadd.f32 %v1802_v42, %v2536_v34  ;;  %v1805_v50 = vadd.f32 %v1804_v47, %v1803_v44  ;;  %v1916_v51 = vpop.f32.mrb[31].mxu1 }
 0x188   : > { %v1917_v52 = vadd.f32 %v1916_v51, %v1915_v46 }
 0x189   : > { %1732 = vst [vmem:[%s2542_s25 + $0x30] sm:$0xff] %v1680_v48   ;;  %v1107_v53 = vadd.f32 %v1914_v45, %v946_v49  ;;  %v949_v54 = vadd.f32 %v1805_v50, %v2536_v34 }
 0x18b   : > { %v1110_v55 = vadd.f32 %v1917_v52, %v949_v54  ;;  %v1806_v56 = vpop.f32.mrb[32].mxu0  ;;  %v1191_v59 = vmax.f32 %v1107_v53, 0.0 }
 0x18c   : > { %v1918_v57 = vpop.f32.mrb[32].mxu1  ;;  %v1807_v58 = vpop.f32.mrb[33].mxu0 }
 0x18d   : > { %v1192_v60 = vmax.f32 %v1110_v55, 0.0  ;;  %v1808_v61 = vadd.f32 %v1807_v58, %v1806_v56  ;;  %v1919_v62 = vpop.f32.mrb[33].mxu1  ;;  %v1809_v63 = vpop.f32.mrb[34].mxu0 }
 0x18e   : > { %v1920_v0 = vadd.f32 %v1919_v62, %v1918_v57  ;;  %v1921_v1 = vpop.f32.mrb[34].mxu1  ;;  %v1810_v2 = vpop.f32.mrb[35].mxu0 }
 0x18f   : > { %v1685_v3 = vpack.c.bf16 %v1192_v60, %v1191_v59  ;;  %v954_v4 = vadd.f32 %v1808_v61, %v2536_v34  ;;  %v1811_v5 = vadd.f32 %v1810_v2, %v1809_v63  ;;  %v1922_v6 = vpop.f32.mrb[35].mxu1 }
 0x190   : > { %v1923_v7 = vadd.f32 %v1922_v6, %v1921_v1 }
 0x191   : > { %1733 = vst [vmem:[%s2542_s25 + $0x38] sm:$0xff] %v1685_v3   ;;  %v1115_v8 = vadd.f32 %v1920_v0, %v954_v4  ;;  %v957_v9 = vadd.f32 %v1811_v5, %v2536_v34 }
 0x193   : > { %v1118_v10 = vadd.f32 %v1923_v7, %v957_v9  ;;  %v1812_v11 = vpop.f32.mrb[36].mxu0  ;;  %v1193_v14 = vmax.f32 %v1115_v8, 0.0 }
 0x194   : > { %v1924_v12 = vpop.f32.mrb[36].mxu1  ;;  %v1813_v13 = vpop.f32.mrb[37].mxu0 }
 0x195   : > { %v1194_v15 = vmax.f32 %v1118_v10, 0.0  ;;  %v1814_v16 = vadd.f32 %v1813_v13, %v1812_v11  ;;  %v1925_v17 = vpop.f32.mrb[37].mxu1  ;;  %v1815_v18 = vpop.f32.mrb[38].mxu0 }
 0x196   : > { %v1926_v19 = vadd.f32 %v1925_v17, %v1924_v12  ;;  %v1927_v20 = vpop.f32.mrb[38].mxu1  ;;  %v1816_v21 = vpop.f32.mrb[39].mxu0 }
 0x197   : > { %v1690_v22 = vpack.c.bf16 %v1194_v15, %v1193_v14  ;;  %v962_v23 = vadd.f32 %v1814_v16, %v2536_v34  ;;  %v1817_v24 = vadd.f32 %v1816_v21, %v1815_v18  ;;  %v1928_v25 = vpop.f32.mrb[39].mxu1 }
 0x198   : > { %v1929_v26 = vadd.f32 %v1928_v25, %v1927_v20 }
 0x199   : > { %1734 = vst [vmem:[%s2542_s25 + $0x40] sm:$0xff] %v1690_v22   ;;  %v1123_v27 = vadd.f32 %v1926_v19, %v962_v23  ;;  %v965_v28 = vadd.f32 %v1817_v24, %v2536_v34 }
 0x19b   : > { %v1126_v29 = vadd.f32 %v1929_v26, %v965_v28  ;;  %v1818_v30 = vpop.f32.mrb[40].mxu0  ;;  %v1195_v33 = vmax.f32 %v1123_v27, 0.0 }
 0x19c   : > { %v1930_v31 = vpop.f32.mrb[40].mxu1  ;;  %v1819_v32 = vpop.f32.mrb[41].mxu0 }
 0x19d   : > { %v1196_v35 = vmax.f32 %v1126_v29, 0.0  ;;  %v1820_v36 = vadd.f32 %v1819_v32, %v1818_v30  ;;  %v1931_v37 = vpop.f32.mrb[41].mxu1  ;;  %v1821_v38 = vpop.f32.mrb[42].mxu0 }
 0x19e   : > { %v1932_v39 = vadd.f32 %v1931_v37, %v1930_v31  ;;  %v1933_v40 = vpop.f32.mrb[42].mxu1  ;;  %v1822_v41 = vpop.f32.mrb[43].mxu0 }
 0x19f   : > { %v1695_v42 = vpack.c.bf16 %v1196_v35, %v1195_v33  ;;  %v970_v43 = vadd.f32 %v1820_v36, %v2536_v34  ;;  %v1823_v44 = vadd.f32 %v1822_v41, %v1821_v38  ;;  %v1934_v45 = vpop.f32.mrb[43].mxu1 }
 0x1a0   : > { %v1935_v46 = vadd.f32 %v1934_v45, %v1933_v40 }
 0x1a1   : > { %1735 = vst [vmem:[%s2542_s25 + $0x48] sm:$0xff] %v1695_v42   ;;  %v1131_v47 = vadd.f32 %v1932_v39, %v970_v43  ;;  %v973_v48 = vadd.f32 %v1823_v44, %v2536_v34 }
 0x1a3   : > { %v1134_v49 = vadd.f32 %v1935_v46, %v973_v48  ;;  %v1824_v50 = vpop.f32.mrb[44].mxu0  ;;  %v1197_v53 = vmax.f32 %v1131_v47, 0.0 }
 0x1a4   : > { %v1936_v51 = vpop.f32.mrb[44].mxu1  ;;  %v1825_v52 = vpop.f32.mrb[45].mxu0 }
 0x1a5   : > { %v1198_v54 = vmax.f32 %v1134_v49, 0.0  ;;  %v1826_v55 = vadd.f32 %v1825_v52, %v1824_v50  ;;  %v1937_v56 = vpop.f32.mrb[45].mxu1  ;;  %v1827_v57 = vpop.f32.mrb[46].mxu0 }
 0x1a6   : > { %v1938_v58 = vadd.f32 %v1937_v56, %v1936_v51  ;;  %v1939_v59 = vpop.f32.mrb[46].mxu1  ;;  %v1828_v60 = vpop.f32.mrb[47].mxu0 }
 0x1a7   : > { %v1700_v61 = vpack.c.bf16 %v1198_v54, %v1197_v53  ;;  %v978_v62 = vadd.f32 %v1826_v55, %v2536_v34  ;;  %v1829_v63 = vadd.f32 %v1828_v60, %v1827_v57  ;;  %v1940_v0 = vpop.f32.mrb[47].mxu1 }
 0x1a8   : > { %v1941_v1 = vadd.f32 %v1940_v0, %v1939_v59 }
 0x1a9   : > { %1736 = vst [vmem:[%s2542_s25 + $0x50] sm:$0xff] %v1700_v61   ;;  %v1139_v2 = vadd.f32 %v1938_v58, %v978_v62  ;;  %v981_v3 = vadd.f32 %v1829_v63, %v2536_v34 }
 0x1ab   : > { %v1142_v4 = vadd.f32 %v1941_v1, %v981_v3  ;;  %v1830_v5 = vpop.f32.mrb[48].mxu0  ;;  %v1199_v8 = vmax.f32 %v1139_v2, 0.0 }
 0x1ac   : > { %v1942_v6 = vpop.f32.mrb[48].mxu1  ;;  %v1831_v7 = vpop.f32.mrb[49].mxu0 }
 0x1ad   : > { %v1200_v9 = vmax.f32 %v1142_v4, 0.0  ;;  %v1832_v10 = vadd.f32 %v1831_v7, %v1830_v5  ;;  %v1943_v11 = vpop.f32.mrb[49].mxu1  ;;  %v1833_v12 = vpop.f32.mrb[50].mxu0 }
 0x1ae   : > { %v1944_v13 = vadd.f32 %v1943_v11, %v1942_v6  ;;  %v1945_v14 = vpop.f32.mrb[50].mxu1  ;;  %v1834_v15 = vpop.f32.mrb[51].mxu0 }
 0x1af   : > { %v1705_v16 = vpack.c.bf16 %v1200_v9, %v1199_v8  ;;  %v986_v17 = vadd.f32 %v1832_v10, %v2536_v34  ;;  %v1835_v18 = vadd.f32 %v1834_v15, %v1833_v12  ;;  %v1946_v19 = vpop.f32.mrb[51].mxu1 }
 0x1b0   : > { %v1947_v20 = vadd.f32 %v1946_v19, %v1945_v14 }
 0x1b1   : > { %1737 = vst [vmem:[%s2542_s25 + $0x58] sm:$0xff] %v1705_v16   ;;  %v1147_v21 = vadd.f32 %v1944_v13, %v986_v17  ;;  %v989_v22 = vadd.f32 %v1835_v18, %v2536_v34 }
 0x1b3   : > { %v1150_v23 = vadd.f32 %v1947_v20, %v989_v22  ;;  %v1836_v24 = vpop.f32.mrb[52].mxu0  ;;  %v1201_v27 = vmax.f32 %v1147_v21, 0.0 }
 0x1b4   : > { %v1948_v25 = vpop.f32.mrb[52].mxu1  ;;  %v1837_v26 = vpop.f32.mrb[53].mxu0 }
 0x1b5   : > { %v1202_v28 = vmax.f32 %v1150_v23, 0.0  ;;  %v1838_v29 = vadd.f32 %v1837_v26, %v1836_v24  ;;  %v1949_v30 = vpop.f32.mrb[53].mxu1  ;;  %v1839_v31 = vpop.f32.mrb[54].mxu0 }
 0x1b6   : > { %v1950_v32 = vadd.f32 %v1949_v30, %v1948_v25  ;;  %v1951_v33 = vpop.f32.mrb[54].mxu1  ;;  %v1840_v35 = vpop.f32.mrb[55].mxu0 }
 0x1b7   : > { %v1710_v36 = vpack.c.bf16 %v1202_v28, %v1201_v27  ;;  %v994_v37 = vadd.f32 %v1838_v29, %v2536_v34  ;;  %v1841_v38 = vadd.f32 %v1840_v35, %v1839_v31  ;;  %v1952_v39 = vpop.f32.mrb[55].mxu1 }
 0x1b8   : > { %v1953_v40 = vadd.f32 %v1952_v39, %v1951_v33 }
 0x1b9   : > { %1738 = vst [vmem:[%s2542_s25 + $0x60] sm:$0xff] %v1710_v36   ;;  %v1155_v41 = vadd.f32 %v1950_v32, %v994_v37  ;;  %v997_v42 = vadd.f32 %v1841_v38, %v2536_v34 }
 0x1bb   : > { %v1158_v43 = vadd.f32 %v1953_v40, %v997_v42  ;;  %v1842_v44 = vpop.f32.mrb[56].mxu0  ;;  %v1203_v47 = vmax.f32 %v1155_v41, 0.0 }
 0x1bc   : > { %v1954_v45 = vpop.f32.mrb[56].mxu1  ;;  %v1843_v46 = vpop.f32.mrb[57].mxu0 }
 0x1bd   : > { %v1204_v48 = vmax.f32 %v1158_v43, 0.0  ;;  %v1844_v49 = vadd.f32 %v1843_v46, %v1842_v44  ;;  %v1955_v50 = vpop.f32.mrb[57].mxu1  ;;  %v1845_v51 = vpop.f32.mrb[58].mxu0 }
 0x1be   : > { %v1956_v52 = vadd.f32 %v1955_v50, %v1954_v45  ;;  %v1957_v53 = vpop.f32.mrb[58].mxu1  ;;  %v1846_v54 = vpop.f32.mrb[59].mxu0 }
 0x1bf   : > { %v1715_v55 = vpack.c.bf16 %v1204_v48, %v1203_v47  ;;  %v1002_v56 = vadd.f32 %v1844_v49, %v2536_v34  ;;  %v1847_v57 = vadd.f32 %v1846_v54, %v1845_v51  ;;  %v1958_v58 = vpop.f32.mrb[59].mxu1 }
 0x1c0   : > { %v1959_v59 = vadd.f32 %v1958_v58, %v1957_v53 }
 0x1c1   : > { %1739 = vst [vmem:[%s2542_s25 + $0x68] sm:$0xff] %v1715_v55   ;;  %v1163_v60 = vadd.f32 %v1956_v52, %v1002_v56  ;;  %v1005_v61 = vadd.f32 %v1847_v57, %v2536_v34 }
 0x1c3   : > { %v1166_v62 = vadd.f32 %v1959_v59, %v1005_v61  ;;  %v1848_v63 = vpop.f32.mrb[60].mxu0  ;;  %v1205_v2 = vmax.f32 %v1163_v60, 0.0 }
 0x1c4   : > { %v1960_v0 = vpop.f32.mrb[60].mxu1  ;;  %v1849_v1 = vpop.f32.mrb[61].mxu0 }
 0x1c5   : > { %v1206_v3 = vmax.f32 %v1166_v62, 0.0  ;;  %v1850_v4 = vadd.f32 %v1849_v1, %v1848_v63  ;;  %v1961_v5 = vpop.f32.mrb[61].mxu1  ;;  %v1851_v6 = vpop.f32.mrb[62].mxu0 }
 0x1c6   : > { %v1962_v7 = vadd.f32 %v1961_v5, %v1960_v0  ;;  %v1963_v8 = vpop.f32.mrb[62].mxu1  ;;  %v1852_v9 = vpop.f32.mrb[63].mxu0 }
 0x1c7   : > { %v1720_v10 = vpack.c.bf16 %v1206_v3, %v1205_v2  ;;  %v1010_v11 = vadd.f32 %v1850_v4, %v2536_v34  ;;  %v1853_v12 = vadd.f32 %v1852_v9, %v1851_v6  ;;  %v1964_v13 = vpop.f32.mrb[63].mxu1 }
 0x1c8   : > { %v1965_v14 = vadd.f32 %v1964_v13, %v1963_v8 }
 0x1c9   : > { %1740 = vst [vmem:[%s2542_s25 + $0x70] sm:$0xff] %v1720_v10   ;;  %v1171_v15 = vadd.f32 %v1962_v7, %v1010_v11  ;;  %v1013_v16 = vadd.f32 %v1853_v12, %v2536_v34 }
 0x1cb   : > { %v1174_v17 = vadd.f32 %v1965_v14, %v1013_v16  ;;  %v1207_v18 = vmax.f32 %v1171_v15, 0.0 }
 0x1cd   : > { %v1208_v19 = vmax.f32 %v1174_v17, 0.0 }
 0x1cf   : > { %v1725_v20 = vpack.c.bf16 %v1208_v19, %v1207_v18 }
 0x1d1   : > { %1741 = vst [vmem:[%s2542_s25 + $0x78] sm:$0xff] %v1725_v20  }
 0x1d2   : > { %2228 = shalt.err (!%p2225_p7)
}
 0x1d3   : > { %s2229_s22 = scalar_lea.hbm %s2593_s27, 2048  ;;  %s2233_s9 = scalar_lea.hbm %s2643_s3, 4096 }
 0x1d4   : > { %p2230_p9 = scmp.ne.s32.totalorder %s2593_s27, %s2229_s22  ;;  %p2234_p5 = scmp.lt.u32.totalorder %s2593_s27, %s2643_s3 }
 0x1d5   : > { %p2235_p11 = scmp.lt.u32.totalorder %s2233_s9, %s2229_s22  ;;  %p2237_p4 = scmp.lt.u32.totalorder %s2229_s22, %s2593_s27 }
 0x1d6   : > { %p2231_p2 = pnand %p2230_p9, %p2407_p12 }
 0x1d7   : > { %p2236_p1 = por %p2235_p11, %p2234_p5 }
 0x1d8   : > { %p2232_p0 = pneg %p2231_p2 }
 0x1d9   : > { %p2238_p6 = por %p2237_p4, %p2236_p1 }
 0x1db   : > { %p2239_p8 = pnand %p2238_p6, %p2232_p0 }
 0x1dd   : > { %2242 = shalt.err (!%p2239_p8)
}
 0x1de   : > { %s2294_s4 = smov 64   ;;  %s2295_s25 = smov 4  }
 0x1df   : > { %1972 = dma.vmem_to_hbm [thread:$0]  (%p2407_p12), %s2595_s5, 2048, %s2593_s27, %s1370_s28, %s2294_s4, %s2294_s4, %s2295_s25  }
 0x1e0 PF: > { %s1398_s26 = sand.u32 1, %s2273_s12   ;;  %p2658_p10 = scmp.ne.s32.totalorder %s2648_s19, 0 }
 0x1e1   : > { %p2659_p13 = scmp.ge.s32.totalorder %s2285_s15, 2  ;;  %s1399_s10 = scalar_lea.sflag [#allocation4], %s1398_s26 }
 0x1e3   : > { %p1983_p3 = pnand %p2659_p13, %p2658_p10 }
 0x1e5   : > { %2268 = dma.done.wait (!%p1983_p3), %s1399_s10, 2048  }
 0x1e6   : > { %2270 = vsyncadd (!%p1983_p3), %s1399_s10, 4294965248  ;;  %p17_p7 = scmp.ge.s32.totalorder %s2372_s24, 4   ;;  %s2660_s12 = smov %s2277_s13 }
 0x1e7   : > { %s2661_s13 = smov %s2281_s14  ;;  %s2662_s14 = smov %s2403_s17 }
 0x1e8   : > { %s2663_s15 = smov %s2372_s24  ;;  %19 = sbr.rel (!%p17_p7) target bundleno = 6 (0x6), region = 81 }
 0x1ef   :  { %1404 = vsyncpa [#allocation3], 1 }
 0x1f0   :  { %1406 = vsyncpa [#allocation3 + $0x1], 1 }
 0x1f1   :  { %1407 = vsyncpa [#allocation6], 1 }
 0x1f2   :  { %1408 = vsyncpa [#allocation4], 1 }
 0x1f3   :  { %1410 = vsyncpa [#allocation4 + $0x1], 1 }

</bundles_post_ra>
